<compile_context>
chip_gen: v5e
topology: v5e:2x2
jax: 0.10.0
libtpu: 0.0.40
codegen_flags: <defaults>
</compile_context>

<pallas_src>
import functools

import jax
import jax.numpy as jnp
from jax.experimental import pallas as pl
from jax.experimental.pallas import tpu as pltpu


# -----------------------------------------------------------------------------
# Small helpers
# -----------------------------------------------------------------------------
def _round_up(x, m):
    return ((x + m - 1) // m) * m


def _pick_tile(dim, cap, align):
    """Largest tile <= cap that divides `dim` and is a multiple of `align`;
    falls back to the full dim (always legal for the (8,128) rule)."""
    if dim <= cap:
        return dim
    start = cap - (cap % align)
    for t in range(start, 0, -align):
        if dim % t == 0:
            return t
    return dim


def _pre_activate(x, pre_act):
    if pre_act == "leaky_relu":
        return jnp.where(x >= 0, x, 0.2 * x)
    if pre_act == "relu":
        return jnp.maximum(x, 0.0)
    return x


# -----------------------------------------------------------------------------
# Grouped, tiled GEMM (bf16 in, f32 accumulate) with fused bias / tanh epilogue
# -----------------------------------------------------------------------------
def _gemm(a, b, bias=None, post_act=None):
    """out[g] = post_act(a[g] @ b[g] + bias), a:(G,M,K) bf16, b:(G,K,Nc) bf16,
    bias:(1,Nc) f32 or None.  Returns (G, M, Nc) f32."""
    G, M, K = a.shape
    Nc = b.shape[2]

    tm = _pick_tile(M, 256, 8)
    tn = _pick_tile(Nc, 256, 128)
    tk = _pick_tile(K, 512, 128)
    n_k = K // tk
    grid = (G, M // tm, Nc // tn, n_k)
    has_bias = bias is not None

    def kernel(*refs):
        if has_bias:
            a_ref, b_ref, bias_ref, o_ref, acc_ref = refs
        else:
            a_ref, b_ref, o_ref, acc_ref = refs
        k = pl.program_id(3)

        @pl.when(k == 0)
        def _():
            acc_ref[...] = jnp.zeros_like(acc_ref)

        acc_ref[...] += jnp.dot(a_ref[...], b_ref[...],
                                preferred_element_type=jnp.float32)

        @pl.when(k == n_k - 1)
        def _():
            out = acc_ref[...]
            if has_bias:
                out = out + bias_ref[...]
            if post_act == "tanh":
                out = jnp.tanh(out)
            o_ref[...] = out.astype(o_ref.dtype)

    in_specs = [
        pl.BlockSpec((None, tm, tk), lambda g, i, j, k: (g, i, k)),
        pl.BlockSpec((None, tk, tn), lambda g, i, j, k: (g, k, j)),
    ]
    operands = [a, b]
    if has_bias:
        in_specs.append(pl.BlockSpec((1, tn), lambda g, i, j, k: (0, j)))
        operands.append(bias)

    flops = 2 * G * M * K * Nc
    transc = G * M * Nc if post_act == "tanh" else 0
    bytes_acc = G * M * K * 2 + G * K * Nc * 2 + G * M * Nc * 4
    if has_bias:
        bytes_acc += Nc * 4

    return pl.pallas_call(
        kernel,
        out_shape=jax.ShapeDtypeStruct((G, M, Nc), jnp.float32),
        grid=grid,
        in_specs=in_specs,
        out_specs=pl.BlockSpec((None, tm, tn), lambda g, i, j, k: (g, i, j)),
        scratch_shapes=[pltpu.VMEM((tm, tn), jnp.float32)],
        compiler_params=pltpu.CompilerParams(
            dimension_semantics=("parallel", "parallel", "parallel", "arbitrary"),
            vmem_limit_bytes=32 * 1024 * 1024,
        ),
        cost_estimate=pl.CostEstimate(
            flops=flops, transcendentals=transc, bytes_accessed=bytes_acc),
    )(*operands)


# -----------------------------------------------------------------------------
# BatchNorm2d (training-mode batch stats), NHWC, tiled over rows
# -----------------------------------------------------------------------------
def _bn_stats_kernel(x_ref, sum_ref, ssq_ref):
    i = pl.program_id(0)

    @pl.when(i == 0)
    def _():
        sum_ref[...] = jnp.zeros_like(sum_ref)
        ssq_ref[...] = jnp.zeros_like(ssq_ref)

    x = x_ref[...]
    sum_ref[...] += jnp.sum(x, axis=0, keepdims=True)
    ssq_ref[...] += jnp.sum(x * x, axis=0, keepdims=True)


def _bn_norm_kernel(x_ref, sum_ref, ssq_ref, gamma_ref, beta_ref, o_ref, *,
                    count, eps):
    inv_n = 1.0 / count
    mean = sum_ref[...] * inv_n
    var = ssq_ref[...] * inv_n - mean * mean
    inv = jax.lax.rsqrt(jnp.maximum(var, 0.0) + eps)
    o_ref[...] = (x_ref[...] - mean) * (inv * gamma_ref[...]) + beta_ref[...]


def _batchnorm(y_nhwc, gamma, beta, eps=1e-5):
    N, H, W, C = y_nhwc.shape
    L = N * H * W
    x2 = y_nhwc.reshape(L, C)
    tl = _pick_tile(L, 512, 8)
    grid = (L // tl,)
    cparams = pltpu.CompilerParams(vmem_limit_bytes=32 * 1024 * 1024,
                                   dimension_semantics=("arbitrary",))

    sums, ssqs = pl.pallas_call(
        _bn_stats_kernel,
        out_shape=(jax.ShapeDtypeStruct((1, C), jnp.float32),
                   jax.ShapeDtypeStruct((1, C), jnp.float32)),
        grid=grid,
        in_specs=[pl.BlockSpec((tl, C), lambda i: (i, 0))],
        out_specs=(pl.BlockSpec((1, C), lambda i: (0, 0)),
                   pl.BlockSpec((1, C), lambda i: (0, 0))),
        compiler_params=cparams,
        cost_estimate=pl.CostEstimate(flops=3 * L * C, transcendentals=0,
                                      bytes_accessed=L * C * 4 + 2 * C * 4),
    )(x2)

    out = pl.pallas_call(
        functools.partial(_bn_norm_kernel, count=float(L), eps=eps),
        out_shape=jax.ShapeDtypeStruct((L, C), jnp.float32),
        grid=grid,
        in_specs=[pl.BlockSpec((tl, C), lambda i: (i, 0)),
                  pl.BlockSpec((1, C), lambda i: (0, 0)),
                  pl.BlockSpec((1, C), lambda i: (0, 0)),
                  pl.BlockSpec((1, C), lambda i: (0, 0)),
                  pl.BlockSpec((1, C), lambda i: (0, 0))],
        out_specs=pl.BlockSpec((tl, C), lambda i: (i, 0)),
        compiler_params=pltpu.CompilerParams(
            vmem_limit_bytes=32 * 1024 * 1024,
            dimension_semantics=("parallel",)),
        cost_estimate=pl.CostEstimate(flops=5 * L * C, transcendentals=C,
                                      bytes_accessed=2 * L * C * 4 + 4 * C * 4),
    )(x2, sums, ssqs, gamma.reshape(1, C), beta.reshape(1, C))
    return out.reshape(N, H, W, C)


# -----------------------------------------------------------------------------
# Conv2d(k=4, s=2, p=1, bias=False)  — NHWC, im2col (bf16) + tiled GEMM
# -----------------------------------------------------------------------------
def _conv2d_down(x, w, pre_act=None):
    N, H, W, Cin = x.shape
    Cout = w.shape[0]                       # PyTorch layout (Cout, Cin, 4, 4)
    Ho, Wo = H // 2, W // 2
    x = _pre_activate(x, pre_act)
    xp = jnp.pad(x.astype(jnp.bfloat16), ((0, 0), (1, 1), (1, 1), (0, 0)))
    taps = []
    for ky in range(4):
        for kx in range(4):
            taps.append(xp[:, ky:ky + 2 * Ho:2, kx:kx + 2 * Wo:2, :])
    a = jnp.concatenate(taps, axis=-1).reshape(1, N * Ho * Wo, 16 * Cin)

    Ncp = _round_up(Cout, 128)              # lane-dense output columns
    wm = jnp.transpose(w, (2, 3, 1, 0)).reshape(16 * Cin, Cout)
    bmat = jnp.pad(wm, ((0, 0), (0, Ncp - Cout))).astype(jnp.bfloat16)[None]

    out = _gemm(a, bmat, bias=None)         # (1, M, Ncp) f32
    return out[0, :, :Cout].reshape(N, Ho, Wo, Cout)


# -----------------------------------------------------------------------------
# ConvTranspose2d(k=4, s=2, p=1, bias=True) — sub-pixel decomposition:
# 4 parity classes, each a stride-1 conv with a 2x2 sub-kernel (K = Cin*4),
# run as one grouped GEMM and interleaved (pixel shuffle) afterwards.
# -----------------------------------------------------------------------------
def _conv_transpose_up(x, w, b, pre_act=None, post_act=None):
    N, H, W, Cin = x.shape
    Cout = w.shape[1]                       # PyTorch layout (Cin, Cout, 4, 4)
    x = _pre_activate(x, pre_act)
    xp = jnp.pad(x.astype(jnp.bfloat16), ((0, 0), (1, 1), (1, 1), (0, 0)))
    M = N * H * W

    patch_groups, w_groups = [], []
    for py in range(2):
        for px in range(2):
            taps = []
            for dy in range(2):
                for dx in range(2):
                    taps.append(xp[:, py + dy:py + dy + H,
                                   px + dx:px + dx + W, :])
            patch_groups.append(
                jnp.concatenate(taps, axis=-1).reshape(M, 4 * Cin))
            # kernel taps used by parity (py,px): rows [3-py, 1-py], cols [3-px, 1-px]
            wsub = w[:, :, [3 - py, 1 - py], :][:, :, :, [3 - px, 1 - px]]
            w_groups.append(
                jnp.transpose(wsub, (2, 3, 0, 1)).reshape(4 * Cin, Cout))

    a = jnp.stack(patch_groups, axis=0)                      # (4, M, 4*Cin) bf16
    Ncp = _round_up(Cout, 128)
    bmat = jnp.pad(jnp.stack(w_groups, axis=0),
                   ((0, 0), (0, 0), (0, Ncp - Cout))).astype(jnp.bfloat16)
    bias = jnp.pad(b.reshape(1, Cout), ((0, 0), (0, Ncp - Cout)))
    bias = bias.astype(jnp.float32)

    out = _gemm(a, bmat, bias=bias, post_act=post_act)       # (4, M, Ncp) f32
    out = out[:, :, :Cout].reshape(2, 2, N, H, W, Cout)
    out = jnp.transpose(out, (2, 3, 0, 4, 1, 5)).reshape(N, 2 * H, 2 * W, Cout)
    return out


# -----------------------------------------------------------------------------
# Parameters & recursive forward (mirrors the PyTorch module exactly)
# -----------------------------------------------------------------------------
def init_unet_params(key, input_nc, output_nc, num_downs, ngf=64, maxngf=512):
    ngf_ = min(ngf, maxngf)
    ngfm = min(ngf * 2, maxngf)
    kd, ku, kb, ks = jax.random.split(key, 4)
    p = {}
    # downconv: Conv2d(input_nc, ngf_, 4, 2, 1, bias=False) (BatchNorm -> no bias)
    p["down_w"] = 0.1 * jax.random.normal(kd, (ngf_, input_nc, 4, 4), jnp.float32)
    # downnorm / upnorm BatchNorm2d affine params (PyTorch default init)
    p["dn_gamma"] = jnp.ones((ngf_,), jnp.float32)
    p["dn_beta"] = jnp.zeros((ngf_,), jnp.float32)
    p["up_gamma"] = jnp.ones((output_nc,), jnp.float32)
    p["up_beta"] = jnp.zeros((output_nc,), jnp.float32)
    if num_downs > 1:
        up_in = ngf_ * 2
        p["sub"] = init_unet_params(ks, ngf_, ngf_, num_downs - 1,
                                    ngf=ngfm, maxngf=maxngf)
    else:
        up_in = ngf_
    # upconv: ConvTranspose2d(up_in, output_nc, 4, 2, 1)  (bias=True)
    p["up_w"] = 0.1 * jax.random.normal(ku, (up_in, output_nc, 4, 4), jnp.float32)
    p["up_b"] = 0.1 * jax.random.normal(kb, (output_nc,), jnp.float32)
    return p


def unet_forward(p, x, start_conv=True):
    """x is NHWC.  Depth is derived from the (static) pytree structure so the
    whole forward can live under jax.jit."""
    has_sub = "sub" in p
    if start_conv:
        y = _conv2d_down(x, p["down_w"])                         # downconv
        y = unet_forward(p["sub"], y, start_conv=False)          # submodel
        # uprelu -> upconv -> tanh (relu on the map, bias+tanh fused in GEMM)
        y = _conv_transpose_up(y, p["up_w"], p["up_b"],
                               pre_act="relu", post_act="tanh")
        return y
    elif has_sub:
        y = _conv2d_down(x, p["down_w"], pre_act="leaky_relu")   # downrelu+conv
        y = _batchnorm(y, p["dn_gamma"], p["dn_beta"])           # downnorm
        y = unet_forward(p["sub"], y, start_conv=False)
        y = _conv_transpose_up(y, p["up_w"], p["up_b"], pre_act="relu")
        y = _batchnorm(y, p["up_gamma"], p["up_beta"])           # upnorm
        return jnp.concatenate([x, y], axis=-1)                  # channel cat
    else:
        y = _conv2d_down(x, p["down_w"], pre_act="leaky_relu")
        y = _conv_transpose_up(y, p["up_w"], p["up_b"], pre_act="relu")
        y = _batchnorm(y, p["up_gamma"], p["up_beta"])
        return jnp.concatenate([x, y], axis=-1)


@jax.jit
def unet_apply(params, x_nchw):
    x_nhwc = jnp.transpose(x_nchw, (0, 2, 3, 1))
    y = unet_forward(params, x_nhwc, start_conv=True)
    return jnp.transpose(y, (0, 3, 1, 2))


if __name__ == "__main__":
    key = jax.random.PRNGKey(0)
    kp, kx = jax.random.split(key)

    N, C, H, W = 2, 4, 16, 16
    num_downs = 3          # exercises start_conv, middle, and innermost branches
    params = init_unet_params(kp, input_nc=C, output_nc=C,
                              num_downs=num_downs, ngf=8, maxngf=32)
    x = jax.random.normal(kx, (N, C, H, W), jnp.float32)

    y = unet_apply(params, x)
    y = jax.block_until_ready(y)

    assert y.shape == (N, C, H, W), y.shape
    assert jnp.isfinite(y).all()
    assert (jnp.abs(y) <= 1.0).all()   # tanh output range
    print("KERNEL_OK")
</pallas_src>

<mosaic_0001>
module attributes {stable_mosaic.version = 11 : i64} {
  func.func @kernel(%arg0: i32, %arg1: i32, %arg2: i32, %arg3: i32, %arg4: memref<1x128x64xbf16, #tpu.memory_space<vmem>>, %arg5: memref<1x64x128xbf16, #tpu.memory_space<vmem>>, %arg6: memref<1x128x128xf32, #tpu.memory_space<vmem>>, %arg7: memref<128x128xf32, #tpu.memory_space<vmem>>) attributes {dimension_semantics = [#tpu.dimension_semantics<parallel>, #tpu.dimension_semantics<parallel>, #tpu.dimension_semantics<parallel>, #tpu.dimension_semantics<arbitrary>], iteration_bounds = array<i64: 1, 1, 1, 1>, scalar_prefetch = 0 : i64, scratch_operands = 1 : i64, tpu.core_type = #tpu.core_type<tc>, window_params = [{transform_indices = @transform_0, window_bounds = array<i64: 1, 128, 64>}, {transform_indices = @transform_1, window_bounds = array<i64: 1, 64, 128>}, {transform_indices = @transform_2, window_bounds = array<i64: 1, 128, 128>}]} {
    %c0_i32 = arith.constant 0 : i32
    %0 = arith.cmpi eq, %arg3, %c0_i32 : i32
    %1 = arith.extui %0 : i1 to i32
    %c0_i32_0 = arith.constant 0 : i32
    %2 = arith.cmpi ne, %1, %c0_i32_0 : i32
    scf.if %2 {
      %cst_12 = arith.constant 0.000000e+00 : f32
      %14 = vector.broadcast %cst_12 : f32 to vector<128x128xf32>
      %c0_13 = arith.constant 0 : index
      %c0_14 = arith.constant 0 : index
      %15 = vector.load %arg7[%c0_13, %c0_14] : memref<128x128xf32, #tpu.memory_space<vmem>>, vector<128x128xf32>
      tpu.vector_store %arg7[%c0_13, %c0_14], %14 {strides = array<i32>} : memref<128x128xf32, #tpu.memory_space<vmem>>, vector<128x128xf32>,
    } else {
    }
    %c0 = arith.constant 0 : index
    %c0_1 = arith.constant 0 : index
    %3 = vector.load %arg7[%c0, %c0_1] : memref<128x128xf32, #tpu.memory_space<vmem>>, vector<128x128xf32>
    %c0_2 = arith.constant 0 : index
    %c0_3 = arith.constant 0 : index
    %c0_4 = arith.constant 0 : index
    %4 = vector.load %arg4[%c0_2, %c0_3, %c0_4] : memref<1x128x64xbf16, #tpu.memory_space<vmem>>, vector<1x128x64xbf16>
    %5 = vector.shape_cast %4 : vector<1x128x64xbf16> to vector<128x64xbf16>
    %c0_5 = arith.constant 0 : index
    %c0_6 = arith.constant 0 : index
    %c0_7 = arith.constant 0 : index
    %6 = vector.load %arg5[%c0_5, %c0_6, %c0_7] : memref<1x64x128xbf16, #tpu.memory_space<vmem>>, vector<1x64x128xbf16>
    %7 = vector.shape_cast %6 : vector<1x64x128xbf16> to vector<64x128xbf16>
    %cst = arith.constant dense<0.000000e+00> : vector<128x128xf32>
    %8 = tpu.matmul %5, %7, %cst {dimension_numbers = #tpu.dot_dimension_numbers<[1], [0], [0], [1], [0, 0, 1, 1], [], []>} : vector<128x64xbf16>, vector<64x128xbf16>, vector<128x128xf32> -> vector<128x128xf32>
    %9 = arith.addf %3, %8 : vector<128x128xf32>
    %c0_8 = arith.constant 0 : index
    %c0_9 = arith.constant 0 : index
    %10 = vector.load %arg7[%c0_8, %c0_9] : memref<128x128xf32, #tpu.memory_space<vmem>>, vector<128x128xf32>
    tpu.vector_store %arg7[%c0_8, %c0_9], %9 {strides = array<i32>} : memref<128x128xf32, #tpu.memory_space<vmem>>, vector<128x128xf32>,
    %c0_i32_10 = arith.constant 0 : i32
    %11 = arith.cmpi eq, %arg3, %c0_i32_10 : i32
    %12 = arith.extui %11 : i1 to i32
    %c0_i32_11 = arith.constant 0 : i32
    %13 = arith.cmpi ne, %12, %c0_i32_11 : i32
    scf.if %13 {
      %c0_12 = arith.constant 0 : index
      %c0_13 = arith.constant 0 : index
      %14 = vector.load %arg7[%c0_12, %c0_13] : memref<128x128xf32, #tpu.memory_space<vmem>>, vector<128x128xf32>
      %c0_14 = arith.constant 0 : index
      %c0_15 = arith.constant 0 : index
      %c0_16 = arith.constant 0 : index
      %15 = vector.load %arg6[%c0_14, %c0_15, %c0_16] : memref<1x128x128xf32, #tpu.memory_space<vmem>>, vector<1x128x128xf32>
      %16 = vector.shape_cast %15 : vector<1x128x128xf32> to vector<128x128xf32>
      %17 = vector.shape_cast %14 : vector<128x128xf32> to vector<1x128x128xf32>
      tpu.vector_store %arg6[%c0_14, %c0_15, %c0_16], %17 {strides = array<i32>} : memref<1x128x128xf32, #tpu.memory_space<vmem>>, vector<1x128x128xf32>,
    } else {
    }
    return
  }
  func.func @transform_0(%arg0: i32, %arg1: i32, %arg2: i32, %arg3: i32) -> (i32, i32, i32) {
    %c0_i32 = arith.constant 0 : i32
    return %arg0, %arg1, %arg3 : i32, i32, i32
  }
  func.func @transform_1(%arg0: i32, %arg1: i32, %arg2: i32, %arg3: i32) -> (i32, i32, i32) {
    %c0_i32 = arith.constant 0 : i32
    return %arg0, %arg3, %arg2 : i32, i32, i32
  }
  func.func @transform_2(%arg0: i32, %arg1: i32, %arg2: i32, %arg3: i32) -> (i32, i32, i32) {
    %c0_i32 = arith.constant 0 : i32
    return %arg0, %arg1, %arg2 : i32, i32, i32
  }
}

module attributes {stable_mosaic.version = 11 : i64} {
  func.func @_bn_stats_kernel(%arg0: i32, %arg1: memref<32x16xf32, #tpu.memory_space<vmem>>, %arg2: memref<1x16xf32, #tpu.memory_space<vmem>>, %arg3: memref<1x16xf32, #tpu.memory_space<vmem>>) attributes {dimension_semantics = [#tpu.dimension_semantics<arbitrary>], iteration_bounds = array<i64: 1>, scalar_prefetch = 0 : i64, scratch_operands = 0 : i64, tpu.core_type = #tpu.core_type<tc>, window_params = [{transform_indices = @transform_0, window_bounds = array<i64: 32, 16>}, {pipeline_mode = #tpu.pipeline_mode<synchronous>, transform_indices = @transform_1, window_bounds = array<i64: 1, 16>}, {pipeline_mode = #tpu.pipeline_mode<synchronous>, transform_indices = @transform_2, window_bounds = array<i64: 1, 16>}]} {
    %c0_i32 = arith.constant 0 : i32
    %0 = arith.cmpi eq, %arg0, %c0_i32 : i32
    %1 = arith.extui %0 : i1 to i32
    %c0_i32_0 = arith.constant 0 : i32
    %2 = arith.cmpi ne, %1, %c0_i32_0 : i32
    scf.if %2 {
      %cst_11 = arith.constant 0.000000e+00 : f32
      %15 = vector.broadcast %cst_11 : f32 to vector<1x16xf32>
      %c0_12 = arith.constant 0 : index
      %c0_13 = arith.constant 0 : index
      %16 = vector.load %arg2[%c0_12, %c0_13] : memref<1x16xf32, #tpu.memory_space<vmem>>, vector<1x16xf32>
      tpu.vector_store %arg2[%c0_12, %c0_13], %15 {strides = array<i32>} : memref<1x16xf32, #tpu.memory_space<vmem>>, vector<1x16xf32>,
      %cst_14 = arith.constant 0.000000e+00 : f32
      %17 = vector.broadcast %cst_14 : f32 to vector<1x16xf32>
      %c0_15 = arith.constant 0 : index
      %c0_16 = arith.constant 0 : index
      %18 = vector.load %arg3[%c0_15, %c0_16] : memref<1x16xf32, #tpu.memory_space<vmem>>, vector<1x16xf32>
      tpu.vector_store %arg3[%c0_15, %c0_16], %17 {strides = array<i32>} : memref<1x16xf32, #tpu.memory_space<vmem>>, vector<1x16xf32>,
    } else {
    }
    %c0 = arith.constant 0 : index
    %c0_1 = arith.constant 0 : index
    %3 = vector.load %arg1[%c0, %c0_1] : memref<32x16xf32, #tpu.memory_space<vmem>>, vector<32x16xf32>
    %c0_2 = arith.constant 0 : index
    %c0_3 = arith.constant 0 : index
    %4 = vector.load %arg2[%c0_2, %c0_3] : memref<1x16xf32, #tpu.memory_space<vmem>>, vector<1x16xf32>
    %cst = arith.constant dense<0.000000e+00> : vector<16xf32>
    %5 = vector.multi_reduction <add>, %3, %cst [0] : vector<32x16xf32> to vector<16xf32>
    %6 = vector.shape_cast %5 : vector<16xf32> to vector<1x16xf32>
    %7 = arith.addf %4, %6 : vector<1x16xf32>
    %c0_4 = arith.constant 0 : index
    %c0_5 = arith.constant 0 : index
    %8 = vector.load %arg2[%c0_4, %c0_5] : memref<1x16xf32, #tpu.memory_space<vmem>>, vector<1x16xf32>
    tpu.vector_store %arg2[%c0_4, %c0_5], %7 {strides = array<i32>} : memref<1x16xf32, #tpu.memory_space<vmem>>, vector<1x16xf32>,
    %c0_6 = arith.constant 0 : index
    %c0_7 = arith.constant 0 : index
    %9 = vector.load %arg3[%c0_6, %c0_7] : memref<1x16xf32, #tpu.memory_space<vmem>>, vector<1x16xf32>
    %10 = arith.mulf %3, %3 : vector<32x16xf32>
    %cst_8 = arith.constant dense<0.000000e+00> : vector<16xf32>
    %11 = vector.multi_reduction <add>, %10, %cst_8 [0] : vector<32x16xf32> to vector<16xf32>
    %12 = vector.shape_cast %11 : vector<16xf32> to vector<1x16xf32>
    %13 = arith.addf %9, %12 : vector<1x16xf32>
    %c0_9 = arith.constant 0 : index
    %c0_10 = arith.constant 0 : index
    %14 = vector.load %arg3[%c0_9, %c0_10] : memref<1x16xf32, #tpu.memory_space<vmem>>, vector<1x16xf32>
    tpu.vector_store %arg3[%c0_9, %c0_10], %13 {strides = array<i32>} : memref<1x16xf32, #tpu.memory_space<vmem>>, vector<1x16xf32>,
    return
  }
  func.func @transform_0(%arg0: i32) -> (i32, i32) {
    %c0_i32 = arith.constant 0 : i32
    %c0_i32_0 = arith.constant 0 : i32
    return %arg0, %c0_i32 : i32, i32
  }
  func.func @transform_1(%arg0: i32) -> (i32, i32) {
    %c0_i32 = arith.constant 0 : i32
    %c0_i32_0 = arith.constant 0 : i32
    %c0_i32_1 = arith.constant 0 : i32
    return %c0_i32, %c0_i32_0 : i32, i32
  }
  func.func @transform_2(%arg0: i32) -> (i32, i32) {
    %c0_i32 = arith.constant 0 : i32
    %c0_i32_0 = arith.constant 0 : i32
    %c0_i32_1 = arith.constant 0 : i32
    return %c0_i32, %c0_i32_0 : i32, i32
  }
}

module attributes {stable_mosaic.version = 11 : i64} {
  func.func @kernel(%arg0: i32, %arg1: i32, %arg2: i32, %arg3: i32, %arg4: memref<1x32x128xbf16, #tpu.memory_space<vmem>>, %arg5: memref<1x128x128xbf16, #tpu.memory_space<vmem>>, %arg6: memref<1x32x128xf32, #tpu.memory_space<vmem>>, %arg7: memref<32x128xf32, #tpu.memory_space<vmem>>) attributes {dimension_semantics = [#tpu.dimension_semantics<parallel>, #tpu.dimension_semantics<parallel>, #tpu.dimension_semantics<parallel>, #tpu.dimension_semantics<arbitrary>], iteration_bounds = array<i64: 1, 1, 1, 1>, scalar_prefetch = 0 : i64, scratch_operands = 1 : i64, tpu.core_type = #tpu.core_type<tc>, window_params = [{transform_indices = @transform_0, window_bounds = array<i64: 1, 32, 128>}, {transform_indices = @transform_1, window_bounds = array<i64: 1, 128, 128>}, {transform_indices = @transform_2, window_bounds = array<i64: 1, 32, 128>}]} {
    %c0_i32 = arith.constant 0 : i32
    %0 = arith.cmpi eq, %arg3, %c0_i32 : i32
    %1 = arith.extui %0 : i1 to i32
    %c0_i32_0 = arith.constant 0 : i32
    %2 = arith.cmpi ne, %1, %c0_i32_0 : i32
    scf.if %2 {
      %cst_12 = arith.constant 0.000000e+00 : f32
      %14 = vector.broadcast %cst_12 : f32 to vector<32x128xf32>
      %c0_13 = arith.constant 0 : index
      %c0_14 = arith.constant 0 : index
      %15 = vector.load %arg7[%c0_13, %c0_14] : memref<32x128xf32, #tpu.memory_space<vmem>>, vector<32x128xf32>
      tpu.vector_store %arg7[%c0_13, %c0_14], %14 {strides = array<i32>} : memref<32x128xf32, #tpu.memory_space<vmem>>, vector<32x128xf32>,
    } else {
    }
    %c0 = arith.constant 0 : index
    %c0_1 = arith.constant 0 : index
    %3 = vector.load %arg7[%c0, %c0_1] : memref<32x128xf32, #tpu.memory_space<vmem>>, vector<32x128xf32>
    %c0_2 = arith.constant 0 : index
    %c0_3 = arith.constant 0 : index
    %c0_4 = arith.constant 0 : index
    %4 = vector.load %arg4[%c0_2, %c0_3, %c0_4] : memref<1x32x128xbf16, #tpu.memory_space<vmem>>, vector<1x32x128xbf16>
    %5 = vector.shape_cast %4 : vector<1x32x128xbf16> to vector<32x128xbf16>
    %c0_5 = arith.constant 0 : index
    %c0_6 = arith.constant 0 : index
    %c0_7 = arith.constant 0 : index
    %6 = vector.load %arg5[%c0_5, %c0_6, %c0_7] : memref<1x128x128xbf16, #tpu.memory_space<vmem>>, vector<1x128x128xbf16>
    %7 = vector.shape_cast %6 : vector<1x128x128xbf16> to vector<128x128xbf16>
    %cst = arith.constant dense<0.000000e+00> : vector<32x128xf32>
    %8 = tpu.matmul %5, %7, %cst {dimension_numbers = #tpu.dot_dimension_numbers<[1], [0], [0], [1], [0, 0, 1, 1], [], []>} : vector<32x128xbf16>, vector<128x128xbf16>, vector<32x128xf32> -> vector<32x128xf32>
    %9 = arith.addf %3, %8 : vector<32x128xf32>
    %c0_8 = arith.constant 0 : index
    %c0_9 = arith.constant 0 : index
    %10 = vector.load %arg7[%c0_8, %c0_9] : memref<32x128xf32, #tpu.memory_space<vmem>>, vector<32x128xf32>
    tpu.vector_store %arg7[%c0_8, %c0_9], %9 {strides = array<i32>} : memref<32x128xf32, #tpu.memory_space<vmem>>, vector<32x128xf32>,
    %c0_i32_10 = arith.constant 0 : i32
    %11 = arith.cmpi eq, %arg3, %c0_i32_10 : i32
    %12 = arith.extui %11 : i1 to i32
    %c0_i32_11 = arith.constant 0 : i32
    %13 = arith.cmpi ne, %12, %c0_i32_11 : i32
    scf.if %13 {
      %c0_12 = arith.constant 0 : index
      %c0_13 = arith.constant 0 : index
      %14 = vector.load %arg7[%c0_12, %c0_13] : memref<32x128xf32, #tpu.memory_space<vmem>>, vector<32x128xf32>
      %c0_14 = arith.constant 0 : index
      %c0_15 = arith.constant 0 : index
      %c0_16 = arith.constant 0 : index
      %15 = vector.load %arg6[%c0_14, %c0_15, %c0_16] : memref<1x32x128xf32, #tpu.memory_space<vmem>>, vector<1x32x128xf32>
      %16 = vector.shape_cast %15 : vector<1x32x128xf32> to vector<32x128xf32>
      %17 = vector.shape_cast %14 : vector<32x128xf32> to vector<1x32x128xf32>
      tpu.vector_store %arg6[%c0_14, %c0_15, %c0_16], %17 {strides = array<i32>} : memref<1x32x128xf32, #tpu.memory_space<vmem>>, vector<1x32x128xf32>,
    } else {
    }
    return
  }
  func.func @transform_0(%arg0: i32, %arg1: i32, %arg2: i32, %arg3: i32) -> (i32, i32, i32) {
    %c0_i32 = arith.constant 0 : i32
    return %arg0, %arg1, %arg3 : i32, i32, i32
  }
  func.func @transform_1(%arg0: i32, %arg1: i32, %arg2: i32, %arg3: i32) -> (i32, i32, i32) {
    %c0_i32 = arith.constant 0 : i32
    return %arg0, %arg3, %arg2 : i32, i32, i32
  }
  func.func @transform_2(%arg0: i32, %arg1: i32, %arg2: i32, %arg3: i32) -> (i32, i32, i32) {
    %c0_i32 = arith.constant 0 : i32
    return %arg0, %arg1, %arg2 : i32, i32, i32
  }
}

module attributes {stable_mosaic.version = 11 : i64} {
  func.func @_bn_norm_kernel(%arg0: i32, %arg1: memref<32x16xf32, #tpu.memory_space<vmem>>, %arg2: memref<1x16xf32, #tpu.memory_space<vmem>>, %arg3: memref<1x16xf32, #tpu.memory_space<vmem>>, %arg4: memref<1x16xf32, #tpu.memory_space<vmem>>, %arg5: memref<1x16xf32, #tpu.memory_space<vmem>>, %arg6: memref<32x16xf32, #tpu.memory_space<vmem>>) attributes {dimension_semantics = [#tpu.dimension_semantics<parallel>], iteration_bounds = array<i64: 1>, scalar_prefetch = 0 : i64, scratch_operands = 0 : i64, tpu.core_type = #tpu.core_type<tc>, window_params = [{transform_indices = @transform_0, window_bounds = array<i64: 32, 16>}, {pipeline_mode = #tpu.pipeline_mode<synchronous>, transform_indices = @transform_1, window_bounds = array<i64: 1, 16>}, {pipeline_mode = #tpu.pipeline_mode<synchronous>, transform_indices = @transform_2, window_bounds = array<i64: 1, 16>}, {pipeline_mode = #tpu.pipeline_mode<synchronous>, transform_indices = @transform_3, window_bounds = array<i64: 1, 16>}, {pipeline_mode = #tpu.pipeline_mode<synchronous>, transform_indices = @transform_4, window_bounds = array<i64: 1, 16>}, {transform_indices = @transform_5, window_bounds = array<i64: 32, 16>}]} {
    %c0 = arith.constant 0 : index
    %c0_0 = arith.constant 0 : index
    %0 = vector.load %arg2[%c0, %c0_0] : memref<1x16xf32, #tpu.memory_space<vmem>>, vector<1x16xf32>
    %cst = arith.constant 3.125000e-02 : f32
    %1 = vector.broadcast %cst : f32 to vector<1x16xf32>
    %2 = arith.mulf %0, %1 : vector<1x16xf32>
    %c0_1 = arith.constant 0 : index
    %c0_2 = arith.constant 0 : index
    %3 = vector.load %arg3[%c0_1, %c0_2] : memref<1x16xf32, #tpu.memory_space<vmem>>, vector<1x16xf32>
    %cst_3 = arith.constant 3.125000e-02 : f32
    %4 = vector.broadcast %cst_3 : f32 to vector<1x16xf32>
    %5 = arith.mulf %3, %4 : vector<1x16xf32>
    %6 = arith.mulf %2, %2 : vector<1x16xf32>
    %7 = arith.subf %5, %6 : vector<1x16xf32>
    %cst_4 = arith.constant 0.000000e+00 : f32
    %8 = vector.broadcast %cst_4 : f32 to vector<1x16xf32>
    %9 = arith.maximumf %7, %8 : vector<1x16xf32>
    %cst_5 = arith.constant 9.99999974E-6 : f32
    %10 = vector.broadcast %cst_5 : f32 to vector<1x16xf32>
    %11 = arith.addf %9, %10 : vector<1x16xf32>
    %12 = math.rsqrt %11 : vector<1x16xf32>
    %c0_6 = arith.constant 0 : index
    %c0_7 = arith.constant 0 : index
    %13 = vector.load %arg1[%c0_6, %c0_7] : memref<32x16xf32, #tpu.memory_space<vmem>>, vector<32x16xf32>
    %14 = vector.broadcast %2 : vector<1x16xf32> to vector<32x16xf32>
    %15 = arith.subf %13, %14 : vector<32x16xf32>
    %c0_8 = arith.constant 0 : index
    %c0_9 = arith.constant 0 : index
    %16 = vector.load %arg4[%c0_8, %c0_9] : memref<1x16xf32, #tpu.memory_space<vmem>>, vector<1x16xf32>
    %17 = arith.mulf %12, %16 : vector<1x16xf32>
    %18 = vector.broadcast %17 : vector<1x16xf32> to vector<32x16xf32>
    %19 = arith.mulf %15, %18 : vector<32x16xf32>
    %c0_10 = arith.constant 0 : index
    %c0_11 = arith.constant 0 : index
    %20 = vector.load %arg5[%c0_10, %c0_11] : memref<1x16xf32, #tpu.memory_space<vmem>>, vector<1x16xf32>
    %21 = vector.broadcast %20 : vector<1x16xf32> to vector<32x16xf32>
    %22 = arith.addf %19, %21 : vector<32x16xf32>
    %c0_12 = arith.constant 0 : index
    %c0_13 = arith.constant 0 : index
    %23 = vector.load %arg6[%c0_12, %c0_13] : memref<32x16xf32, #tpu.memory_space<vmem>>, vector<32x16xf32>
    tpu.vector_store %arg6[%c0_12, %c0_13], %22 {strides = array<i32>} : memref<32x16xf32, #tpu.memory_space<vmem>>, vector<32x16xf32>,
    return
  }
  func.func @transform_0(%arg0: i32) -> (i32, i32) {
    %c0_i32 = arith.constant 0 : i32
    %c0_i32_0 = arith.constant 0 : i32
    return %arg0, %c0_i32 : i32, i32
  }
  func.func @transform_1(%arg0: i32) -> (i32, i32) {
    %c0_i32 = arith.constant 0 : i32
    %c0_i32_0 = arith.constant 0 : i32
    %c0_i32_1 = arith.constant 0 : i32
    return %c0_i32, %c0_i32_0 : i32, i32
  }
  func.func @transform_2(%arg0: i32) -> (i32, i32) {
    %c0_i32 = arith.constant 0 : i32
    %c0_i32_0 = arith.constant 0 : i32
    %c0_i32_1 = arith.constant 0 : i32
    return %c0_i32, %c0_i32_0 : i32, i32
  }
  func.func @transform_3(%arg0: i32) -> (i32, i32) {
    %c0_i32 = arith.constant 0 : i32
    %c0_i32_0 = arith.constant 0 : i32
    %c0_i32_1 = arith.constant 0 : i32
    return %c0_i32, %c0_i32_0 : i32, i32
  }
  func.func @transform_4(%arg0: i32) -> (i32, i32) {
    %c0_i32 = arith.constant 0 : i32
    %c0_i32_0 = arith.constant 0 : i32
    %c0_i32_1 = arith.constant 0 : i32
    return %c0_i32, %c0_i32_0 : i32, i32
  }
  func.func @transform_5(%arg0: i32) -> (i32, i32) {
    %c0_i32 = arith.constant 0 : i32
    %c0_i32_0 = arith.constant 0 : i32
    return %arg0, %c0_i32 : i32, i32
  }
}

module attributes {stable_mosaic.version = 11 : i64} {
  func.func @kernel(%arg0: i32, %arg1: i32, %arg2: i32, %arg3: i32, %arg4: memref<1x8x256xbf16, #tpu.memory_space<vmem>>, %arg5: memref<1x256x128xbf16, #tpu.memory_space<vmem>>, %arg6: memref<1x8x128xf32, #tpu.memory_space<vmem>>, %arg7: memref<8x128xf32, #tpu.memory_space<vmem>>) attributes {dimension_semantics = [#tpu.dimension_semantics<parallel>, #tpu.dimension_semantics<parallel>, #tpu.dimension_semantics<parallel>, #tpu.dimension_semantics<arbitrary>], iteration_bounds = array<i64: 1, 1, 1, 1>, scalar_prefetch = 0 : i64, scratch_operands = 1 : i64, tpu.core_type = #tpu.core_type<tc>, window_params = [{transform_indices = @transform_0, window_bounds = array<i64: 1, 8, 256>}, {transform_indices = @transform_1, window_bounds = array<i64: 1, 256, 128>}, {transform_indices = @transform_2, window_bounds = array<i64: 1, 8, 128>}]} {
    %c0_i32 = arith.constant 0 : i32
    %0 = arith.cmpi eq, %arg3, %c0_i32 : i32
    %1 = arith.extui %0 : i1 to i32
    %c0_i32_0 = arith.constant 0 : i32
    %2 = arith.cmpi ne, %1, %c0_i32_0 : i32
    scf.if %2 {
      %cst_12 = arith.constant 0.000000e+00 : f32
      %14 = vector.broadcast %cst_12 : f32 to vector<8x128xf32>
      %c0_13 = arith.constant 0 : index
      %c0_14 = arith.constant 0 : index
      %15 = vector.load %arg7[%c0_13, %c0_14] : memref<8x128xf32, #tpu.memory_space<vmem>>, vector<8x128xf32>
      tpu.vector_store %arg7[%c0_13, %c0_14], %14 {strides = array<i32>} : memref<8x128xf32, #tpu.memory_space<vmem>>, vector<8x128xf32>,
    } else {
    }
    %c0 = arith.constant 0 : index
    %c0_1 = arith.constant 0 : index
    %3 = vector.load %arg7[%c0, %c0_1] : memref<8x128xf32, #tpu.memory_space<vmem>>, vector<8x128xf32>
    %c0_2 = arith.constant 0 : index
    %c0_3 = arith.constant 0 : index
    %c0_4 = arith.constant 0 : index
    %4 = vector.load %arg4[%c0_2, %c0_3, %c0_4] : memref<1x8x256xbf16, #tpu.memory_space<vmem>>, vector<1x8x256xbf16>
    %5 = vector.shape_cast %4 : vector<1x8x256xbf16> to vector<8x256xbf16>
    %c0_5 = arith.constant 0 : index
    %c0_6 = arith.constant 0 : index
    %c0_7 = arith.constant 0 : index
    %6 = vector.load %arg5[%c0_5, %c0_6, %c0_7] : memref<1x256x128xbf16, #tpu.memory_space<vmem>>, vector<1x256x128xbf16>
    %7 = vector.shape_cast %6 : vector<1x256x128xbf16> to vector<256x128xbf16>
    %cst = arith.constant dense<0.000000e+00> : vector<8x128xf32>
    %8 = tpu.matmul %5, %7, %cst {dimension_numbers = #tpu.dot_dimension_numbers<[1], [0], [0], [1], [0, 0, 1, 1], [], []>} : vector<8x256xbf16>, vector<256x128xbf16>, vector<8x128xf32> -> vector<8x128xf32>
    %9 = arith.addf %3, %8 : vector<8x128xf32>
    %c0_8 = arith.constant 0 : index
    %c0_9 = arith.constant 0 : index
    %10 = vector.load %arg7[%c0_8, %c0_9] : memref<8x128xf32, #tpu.memory_space<vmem>>, vector<8x128xf32>
    tpu.vector_store %arg7[%c0_8, %c0_9], %9 {strides = array<i32>} : memref<8x128xf32, #tpu.memory_space<vmem>>, vector<8x128xf32>,
    %c0_i32_10 = arith.constant 0 : i32
    %11 = arith.cmpi eq, %arg3, %c0_i32_10 : i32
    %12 = arith.extui %11 : i1 to i32
    %c0_i32_11 = arith.constant 0 : i32
    %13 = arith.cmpi ne, %12, %c0_i32_11 : i32
    scf.if %13 {
      %c0_12 = arith.constant 0 : index
      %c0_13 = arith.constant 0 : index
      %14 = vector.load %arg7[%c0_12, %c0_13] : memref<8x128xf32, #tpu.memory_space<vmem>>, vector<8x128xf32>
      %c0_14 = arith.constant 0 : index
      %c0_15 = arith.constant 0 : index
      %c0_16 = arith.constant 0 : index
      %15 = vector.load %arg6[%c0_14, %c0_15, %c0_16] : memref<1x8x128xf32, #tpu.memory_space<vmem>>, vector<1x8x128xf32>
      %16 = vector.shape_cast %15 : vector<1x8x128xf32> to vector<8x128xf32>
      %17 = vector.shape_cast %14 : vector<8x128xf32> to vector<1x8x128xf32>
      tpu.vector_store %arg6[%c0_14, %c0_15, %c0_16], %17 {strides = array<i32>} : memref<1x8x128xf32, #tpu.memory_space<vmem>>, vector<1x8x128xf32>,
    } else {
    }
    return
  }
  func.func @transform_0(%arg0: i32, %arg1: i32, %arg2: i32, %arg3: i32) -> (i32, i32, i32) {
    %c0_i32 = arith.constant 0 : i32
    return %arg0, %arg1, %arg3 : i32, i32, i32
  }
  func.func @transform_1(%arg0: i32, %arg1: i32, %arg2: i32, %arg3: i32) -> (i32, i32, i32) {
    %c0_i32 = arith.constant 0 : i32
    return %arg0, %arg3, %arg2 : i32, i32, i32
  }
  func.func @transform_2(%arg0: i32, %arg1: i32, %arg2: i32, %arg3: i32) -> (i32, i32, i32) {
    %c0_i32 = arith.constant 0 : i32
    return %arg0, %arg1, %arg2 : i32, i32, i32
  }
}

module attributes {stable_mosaic.version = 11 : i64} {
  func.func @kernel(%arg0: i32, %arg1: i32, %arg2: i32, %arg3: i32, %arg4: memref<1x8x128xbf16, #tpu.memory_space<vmem>>, %arg5: memref<1x128x128xbf16, #tpu.memory_space<vmem>>, %arg6: memref<1x128xf32, #tpu.memory_space<vmem>>, %arg7: memref<1x8x128xf32, #tpu.memory_space<vmem>>, %arg8: memref<8x128xf32, #tpu.memory_space<vmem>>) attributes {dimension_semantics = [#tpu.dimension_semantics<parallel>, #tpu.dimension_semantics<parallel>, #tpu.dimension_semantics<parallel>, #tpu.dimension_semantics<arbitrary>], iteration_bounds = array<i64: 4, 1, 1, 1>, scalar_prefetch = 0 : i64, scratch_operands = 1 : i64, tpu.core_type = #tpu.core_type<tc>, window_params = [{transform_indices = @transform_0, window_bounds = array<i64: 1, 8, 128>}, {transform_indices = @transform_1, window_bounds = array<i64: 1, 128, 128>}, {transform_indices = @transform_2, window_bounds = array<i64: 1, 128>}, {transform_indices = @transform_3, window_bounds = array<i64: 1, 8, 128>}]} {
    %c0_i32 = arith.constant 0 : i32
    %0 = arith.cmpi eq, %arg3, %c0_i32 : i32
    %1 = arith.extui %0 : i1 to i32
    %c0_i32_0 = arith.constant 0 : i32
    %2 = arith.cmpi ne, %1, %c0_i32_0 : i32
    scf.if %2 {
      %cst_12 = arith.constant 0.000000e+00 : f32
      %14 = vector.broadcast %cst_12 : f32 to vector<8x128xf32>
      %c0_13 = arith.constant 0 : index
      %c0_14 = arith.constant 0 : index
      %15 = vector.load %arg8[%c0_13, %c0_14] : memref<8x128xf32, #tpu.memory_space<vmem>>, vector<8x128xf32>
      tpu.vector_store %arg8[%c0_13, %c0_14], %14 {strides = array<i32>} : memref<8x128xf32, #tpu.memory_space<vmem>>, vector<8x128xf32>,
    } else {
    }
    %c0 = arith.constant 0 : index
    %c0_1 = arith.constant 0 : index
    %3 = vector.load %arg8[%c0, %c0_1] : memref<8x128xf32, #tpu.memory_space<vmem>>, vector<8x128xf32>
    %c0_2 = arith.constant 0 : index
    %c0_3 = arith.constant 0 : index
    %c0_4 = arith.constant 0 : index
    %4 = vector.load %arg4[%c0_2, %c0_3, %c0_4] : memref<1x8x128xbf16, #tpu.memory_space<vmem>>, vector<1x8x128xbf16>
    %5 = vector.shape_cast %4 : vector<1x8x128xbf16> to vector<8x128xbf16>
    %c0_5 = arith.constant 0 : index
    %c0_6 = arith.constant 0 : index
    %c0_7 = arith.constant 0 : index
    %6 = vector.load %arg5[%c0_5, %c0_6, %c0_7] : memref<1x128x128xbf16, #tpu.memory_space<vmem>>, vector<1x128x128xbf16>
    %7 = vector.shape_cast %6 : vector<1x128x128xbf16> to vector<128x128xbf16>
    %cst = arith.constant dense<0.000000e+00> : vector<8x128xf32>
    %8 = tpu.matmul %5, %7, %cst {dimension_numbers = #tpu.dot_dimension_numbers<[1], [0], [0], [1], [0, 0, 1, 1], [], []>} : vector<8x128xbf16>, vector<128x128xbf16>, vector<8x128xf32> -> vector<8x128xf32>
    %9 = arith.addf %3, %8 : vector<8x128xf32>
    %c0_8 = arith.constant 0 : index
    %c0_9 = arith.constant 0 : index
    %10 = vector.load %arg8[%c0_8, %c0_9] : memref<8x128xf32, #tpu.memory_space<vmem>>, vector<8x128xf32>
    tpu.vector_store %arg8[%c0_8, %c0_9], %9 {strides = array<i32>} : memref<8x128xf32, #tpu.memory_space<vmem>>, vector<8x128xf32>,
    %c0_i32_10 = arith.constant 0 : i32
    %11 = arith.cmpi eq, %arg3, %c0_i32_10 : i32
    %12 = arith.extui %11 : i1 to i32
    %c0_i32_11 = arith.constant 0 : i32
    %13 = arith.cmpi ne, %12, %c0_i32_11 : i32
    scf.if %13 {
      %c0_12 = arith.constant 0 : index
      %c0_13 = arith.constant 0 : index
      %14 = vector.load %arg8[%c0_12, %c0_13] : memref<8x128xf32, #tpu.memory_space<vmem>>, vector<8x128xf32>
      %c0_14 = arith.constant 0 : index
      %c0_15 = arith.constant 0 : index
      %15 = vector.load %arg6[%c0_14, %c0_15] : memref<1x128xf32, #tpu.memory_space<vmem>>, vector<1x128xf32>
      %16 = vector.broadcast %15 : vector<1x128xf32> to vector<8x128xf32>
      %17 = arith.addf %14, %16 : vector<8x128xf32>
      %c0_16 = arith.constant 0 : index
      %c0_17 = arith.constant 0 : index
      %c0_18 = arith.constant 0 : index
      %18 = vector.load %arg7[%c0_16, %c0_17, %c0_18] : memref<1x8x128xf32, #tpu.memory_space<vmem>>, vector<1x8x128xf32>
      %19 = vector.shape_cast %18 : vector<1x8x128xf32> to vector<8x128xf32>
      %20 = vector.shape_cast %17 : vector<8x128xf32> to vector<1x8x128xf32>
      tpu.vector_store %arg7[%c0_16, %c0_17, %c0_18], %20 {strides = array<i32>} : memref<1x8x128xf32, #tpu.memory_space<vmem>>, vector<1x8x128xf32>,
    } else {
    }
    return
  }
  func.func @transform_0(%arg0: i32, %arg1: i32, %arg2: i32, %arg3: i32) -> (i32, i32, i32) {
    %c0_i32 = arith.constant 0 : i32
    return %arg0, %arg1, %arg3 : i32, i32, i32
  }
  func.func @transform_1(%arg0: i32, %arg1: i32, %arg2: i32, %arg3: i32) -> (i32, i32, i32) {
    %c0_i32 = arith.constant 0 : i32
    return %arg0, %arg3, %arg2 : i32, i32, i32
  }
  func.func @transform_2(%arg0: i32, %arg1: i32, %arg2: i32, %arg3: i32) -> (i32, i32) {
    %c0_i32 = arith.constant 0 : i32
    %c0_i32_0 = arith.constant 0 : i32
    return %c0_i32, %arg2 : i32, i32
  }
  func.func @transform_3(%arg0: i32, %arg1: i32, %arg2: i32, %arg3: i32) -> (i32, i32, i32) {
    %c0_i32 = arith.constant 0 : i32
    return %arg0, %arg1, %arg2 : i32, i32, i32
  }
}

module attributes {stable_mosaic.version = 11 : i64} {
  func.func @kernel(%arg0: i32, %arg1: i32, %arg2: i32, %arg3: i32, %arg4: memref<1x32x128xbf16, #tpu.memory_space<vmem>>, %arg5: memref<1x128x128xbf16, #tpu.memory_space<vmem>>, %arg6: memref<1x128xf32, #tpu.memory_space<vmem>>, %arg7: memref<1x32x128xf32, #tpu.memory_space<vmem>>, %arg8: memref<32x128xf32, #tpu.memory_space<vmem>>) attributes {dimension_semantics = [#tpu.dimension_semantics<parallel>, #tpu.dimension_semantics<parallel>, #tpu.dimension_semantics<parallel>, #tpu.dimension_semantics<arbitrary>], iteration_bounds = array<i64: 4, 1, 1, 1>, scalar_prefetch = 0 : i64, scratch_operands = 1 : i64, tpu.core_type = #tpu.core_type<tc>, window_params = [{transform_indices = @transform_0, window_bounds = array<i64: 1, 32, 128>}, {transform_indices = @transform_1, window_bounds = array<i64: 1, 128, 128>}, {transform_indices = @transform_2, window_bounds = array<i64: 1, 128>}, {transform_indices = @transform_3, window_bounds = array<i64: 1, 32, 128>}]} {
    %c0_i32 = arith.constant 0 : i32
    %0 = arith.cmpi eq, %arg3, %c0_i32 : i32
    %1 = arith.extui %0 : i1 to i32
    %c0_i32_0 = arith.constant 0 : i32
    %2 = arith.cmpi ne, %1, %c0_i32_0 : i32
    scf.if %2 {
      %cst_12 = arith.constant 0.000000e+00 : f32
      %14 = vector.broadcast %cst_12 : f32 to vector<32x128xf32>
      %c0_13 = arith.constant 0 : index
      %c0_14 = arith.constant 0 : index
      %15 = vector.load %arg8[%c0_13, %c0_14] : memref<32x128xf32, #tpu.memory_space<vmem>>, vector<32x128xf32>
      tpu.vector_store %arg8[%c0_13, %c0_14], %14 {strides = array<i32>} : memref<32x128xf32, #tpu.memory_space<vmem>>, vector<32x128xf32>,
    } else {
    }
    %c0 = arith.constant 0 : index
    %c0_1 = arith.constant 0 : index
    %3 = vector.load %arg8[%c0, %c0_1] : memref<32x128xf32, #tpu.memory_space<vmem>>, vector<32x128xf32>
    %c0_2 = arith.constant 0 : index
    %c0_3 = arith.constant 0 : index
    %c0_4 = arith.constant 0 : index
    %4 = vector.load %arg4[%c0_2, %c0_3, %c0_4] : memref<1x32x128xbf16, #tpu.memory_space<vmem>>, vector<1x32x128xbf16>
    %5 = vector.shape_cast %4 : vector<1x32x128xbf16> to vector<32x128xbf16>
    %c0_5 = arith.constant 0 : index
    %c0_6 = arith.constant 0 : index
    %c0_7 = arith.constant 0 : index
    %6 = vector.load %arg5[%c0_5, %c0_6, %c0_7] : memref<1x128x128xbf16, #tpu.memory_space<vmem>>, vector<1x128x128xbf16>
    %7 = vector.shape_cast %6 : vector<1x128x128xbf16> to vector<128x128xbf16>
    %cst = arith.constant dense<0.000000e+00> : vector<32x128xf32>
    %8 = tpu.matmul %5, %7, %cst {dimension_numbers = #tpu.dot_dimension_numbers<[1], [0], [0], [1], [0, 0, 1, 1], [], []>} : vector<32x128xbf16>, vector<128x128xbf16>, vector<32x128xf32> -> vector<32x128xf32>
    %9 = arith.addf %3, %8 : vector<32x128xf32>
    %c0_8 = arith.constant 0 : index
    %c0_9 = arith.constant 0 : index
    %10 = vector.load %arg8[%c0_8, %c0_9] : memref<32x128xf32, #tpu.memory_space<vmem>>, vector<32x128xf32>
    tpu.vector_store %arg8[%c0_8, %c0_9], %9 {strides = array<i32>} : memref<32x128xf32, #tpu.memory_space<vmem>>, vector<32x128xf32>,
    %c0_i32_10 = arith.constant 0 : i32
    %11 = arith.cmpi eq, %arg3, %c0_i32_10 : i32
    %12 = arith.extui %11 : i1 to i32
    %c0_i32_11 = arith.constant 0 : i32
    %13 = arith.cmpi ne, %12, %c0_i32_11 : i32
    scf.if %13 {
      %c0_12 = arith.constant 0 : index
      %c0_13 = arith.constant 0 : index
      %14 = vector.load %arg8[%c0_12, %c0_13] : memref<32x128xf32, #tpu.memory_space<vmem>>, vector<32x128xf32>
      %c0_14 = arith.constant 0 : index
      %c0_15 = arith.constant 0 : index
      %15 = vector.load %arg6[%c0_14, %c0_15] : memref<1x128xf32, #tpu.memory_space<vmem>>, vector<1x128xf32>
      %16 = vector.broadcast %15 : vector<1x128xf32> to vector<32x128xf32>
      %17 = arith.addf %14, %16 : vector<32x128xf32>
      %c0_16 = arith.constant 0 : index
      %c0_17 = arith.constant 0 : index
      %c0_18 = arith.constant 0 : index
      %18 = vector.load %arg7[%c0_16, %c0_17, %c0_18] : memref<1x32x128xf32, #tpu.memory_space<vmem>>, vector<1x32x128xf32>
      %19 = vector.shape_cast %18 : vector<1x32x128xf32> to vector<32x128xf32>
      %20 = vector.shape_cast %17 : vector<32x128xf32> to vector<1x32x128xf32>
      tpu.vector_store %arg7[%c0_16, %c0_17, %c0_18], %20 {strides = array<i32>} : memref<1x32x128xf32, #tpu.memory_space<vmem>>, vector<1x32x128xf32>,
    } else {
    }
    return
  }
  func.func @transform_0(%arg0: i32, %arg1: i32, %arg2: i32, %arg3: i32) -> (i32, i32, i32) {
    %c0_i32 = arith.constant 0 : i32
    return %arg0, %arg1, %arg3 : i32, i32, i32
  }
  func.func @transform_1(%arg0: i32, %arg1: i32, %arg2: i32, %arg3: i32) -> (i32, i32, i32) {
    %c0_i32 = arith.constant 0 : i32
    return %arg0, %arg3, %arg2 : i32, i32, i32
  }
  func.func @transform_2(%arg0: i32, %arg1: i32, %arg2: i32, %arg3: i32) -> (i32, i32) {
    %c0_i32 = arith.constant 0 : i32
    %c0_i32_0 = arith.constant 0 : i32
    return %c0_i32, %arg2 : i32, i32
  }
  func.func @transform_3(%arg0: i32, %arg1: i32, %arg2: i32, %arg3: i32) -> (i32, i32, i32) {
    %c0_i32 = arith.constant 0 : i32
    return %arg0, %arg1, %arg2 : i32, i32, i32
  }
}

module attributes {stable_mosaic.version = 11 : i64} {
  func.func @_bn_stats_kernel(%arg0: i32, %arg1: memref<128x8xf32, #tpu.memory_space<vmem>>, %arg2: memref<1x8xf32, #tpu.memory_space<vmem>>, %arg3: memref<1x8xf32, #tpu.memory_space<vmem>>) attributes {dimension_semantics = [#tpu.dimension_semantics<arbitrary>], iteration_bounds = array<i64: 1>, scalar_prefetch = 0 : i64, scratch_operands = 0 : i64, tpu.core_type = #tpu.core_type<tc>, window_params = [{transform_indices = @transform_0, window_bounds = array<i64: 128, 8>}, {pipeline_mode = #tpu.pipeline_mode<synchronous>, transform_indices = @transform_1, window_bounds = array<i64: 1, 8>}, {pipeline_mode = #tpu.pipeline_mode<synchronous>, transform_indices = @transform_2, window_bounds = array<i64: 1, 8>}]} {
    %c0_i32 = arith.constant 0 : i32
    %0 = arith.cmpi eq, %arg0, %c0_i32 : i32
    %1 = arith.extui %0 : i1 to i32
    %c0_i32_0 = arith.constant 0 : i32
    %2 = arith.cmpi ne, %1, %c0_i32_0 : i32
    scf.if %2 {
      %cst_11 = arith.constant 0.000000e+00 : f32
      %15 = vector.broadcast %cst_11 : f32 to vector<1x8xf32>
      %c0_12 = arith.constant 0 : index
      %c0_13 = arith.constant 0 : index
      %16 = vector.load %arg2[%c0_12, %c0_13] : memref<1x8xf32, #tpu.memory_space<vmem>>, vector<1x8xf32>
      tpu.vector_store %arg2[%c0_12, %c0_13], %15 {strides = array<i32>} : memref<1x8xf32, #tpu.memory_space<vmem>>, vector<1x8xf32>,
      %cst_14 = arith.constant 0.000000e+00 : f32
      %17 = vector.broadcast %cst_14 : f32 to vector<1x8xf32>
      %c0_15 = arith.constant 0 : index
      %c0_16 = arith.constant 0 : index
      %18 = vector.load %arg3[%c0_15, %c0_16] : memref<1x8xf32, #tpu.memory_space<vmem>>, vector<1x8xf32>
      tpu.vector_store %arg3[%c0_15, %c0_16], %17 {strides = array<i32>} : memref<1x8xf32, #tpu.memory_space<vmem>>, vector<1x8xf32>,
    } else {
    }
    %c0 = arith.constant 0 : index
    %c0_1 = arith.constant 0 : index
    %3 = vector.load %arg1[%c0, %c0_1] : memref<128x8xf32, #tpu.memory_space<vmem>>, vector<128x8xf32>
    %c0_2 = arith.constant 0 : index
    %c0_3 = arith.constant 0 : index
    %4 = vector.load %arg2[%c0_2, %c0_3] : memref<1x8xf32, #tpu.memory_space<vmem>>, vector<1x8xf32>
    %cst = arith.constant dense<0.000000e+00> : vector<8xf32>
    %5 = vector.multi_reduction <add>, %3, %cst [0] : vector<128x8xf32> to vector<8xf32>
    %6 = vector.shape_cast %5 : vector<8xf32> to vector<1x8xf32>
    %7 = arith.addf %4, %6 : vector<1x8xf32>
    %c0_4 = arith.constant 0 : index
    %c0_5 = arith.constant 0 : index
    %8 = vector.load %arg2[%c0_4, %c0_5] : memref<1x8xf32, #tpu.memory_space<vmem>>, vector<1x8xf32>
    tpu.vector_store %arg2[%c0_4, %c0_5], %7 {strides = array<i32>} : memref<1x8xf32, #tpu.memory_space<vmem>>, vector<1x8xf32>,
    %c0_6 = arith.constant 0 : index
    %c0_7 = arith.constant 0 : index
    %9 = vector.load %arg3[%c0_6, %c0_7] : memref<1x8xf32, #tpu.memory_space<vmem>>, vector<1x8xf32>
    %10 = arith.mulf %3, %3 : vector<128x8xf32>
    %cst_8 = arith.constant dense<0.000000e+00> : vector<8xf32>
    %11 = vector.multi_reduction <add>, %10, %cst_8 [0] : vector<128x8xf32> to vector<8xf32>
    %12 = vector.shape_cast %11 : vector<8xf32> to vector<1x8xf32>
    %13 = arith.addf %9, %12 : vector<1x8xf32>
    %c0_9 = arith.constant 0 : index
    %c0_10 = arith.constant 0 : index
    %14 = vector.load %arg3[%c0_9, %c0_10] : memref<1x8xf32, #tpu.memory_space<vmem>>, vector<1x8xf32>
    tpu.vector_store %arg3[%c0_9, %c0_10], %13 {strides = array<i32>} : memref<1x8xf32, #tpu.memory_space<vmem>>, vector<1x8xf32>,
    return
  }
  func.func @transform_0(%arg0: i32) -> (i32, i32) {
    %c0_i32 = arith.constant 0 : i32
    %c0_i32_0 = arith.constant 0 : i32
    return %arg0, %c0_i32 : i32, i32
  }
  func.func @transform_1(%arg0: i32) -> (i32, i32) {
    %c0_i32 = arith.constant 0 : i32
    %c0_i32_0 = arith.constant 0 : i32
    %c0_i32_1 = arith.constant 0 : i32
    return %c0_i32, %c0_i32_0 : i32, i32
  }
  func.func @transform_2(%arg0: i32) -> (i32, i32) {
    %c0_i32 = arith.constant 0 : i32
    %c0_i32_0 = arith.constant 0 : i32
    %c0_i32_1 = arith.constant 0 : i32
    return %c0_i32, %c0_i32_0 : i32, i32
  }
}

module attributes {stable_mosaic.version = 11 : i64} {
  func.func @_bn_norm_kernel(%arg0: i32, %arg1: memref<128x8xf32, #tpu.memory_space<vmem>>, %arg2: memref<1x8xf32, #tpu.memory_space<vmem>>, %arg3: memref<1x8xf32, #tpu.memory_space<vmem>>, %arg4: memref<1x8xf32, #tpu.memory_space<vmem>>, %arg5: memref<1x8xf32, #tpu.memory_space<vmem>>, %arg6: memref<128x8xf32, #tpu.memory_space<vmem>>) attributes {dimension_semantics = [#tpu.dimension_semantics<parallel>], iteration_bounds = array<i64: 1>, scalar_prefetch = 0 : i64, scratch_operands = 0 : i64, tpu.core_type = #tpu.core_type<tc>, window_params = [{transform_indices = @transform_0, window_bounds = array<i64: 128, 8>}, {pipeline_mode = #tpu.pipeline_mode<synchronous>, transform_indices = @transform_1, window_bounds = array<i64: 1, 8>}, {pipeline_mode = #tpu.pipeline_mode<synchronous>, transform_indices = @transform_2, window_bounds = array<i64: 1, 8>}, {pipeline_mode = #tpu.pipeline_mode<synchronous>, transform_indices = @transform_3, window_bounds = array<i64: 1, 8>}, {pipeline_mode = #tpu.pipeline_mode<synchronous>, transform_indices = @transform_4, window_bounds = array<i64: 1, 8>}, {transform_indices = @transform_5, window_bounds = array<i64: 128, 8>}]} {
    %c0 = arith.constant 0 : index
    %c0_0 = arith.constant 0 : index
    %0 = vector.load %arg2[%c0, %c0_0] : memref<1x8xf32, #tpu.memory_space<vmem>>, vector<1x8xf32>
    %cst = arith.constant 7.812500e-03 : f32
    %1 = vector.broadcast %cst : f32 to vector<1x8xf32>
    %2 = arith.mulf %0, %1 : vector<1x8xf32>
    %c0_1 = arith.constant 0 : index
    %c0_2 = arith.constant 0 : index
    %3 = vector.load %arg3[%c0_1, %c0_2] : memref<1x8xf32, #tpu.memory_space<vmem>>, vector<1x8xf32>
    %cst_3 = arith.constant 7.812500e-03 : f32
    %4 = vector.broadcast %cst_3 : f32 to vector<1x8xf32>
    %5 = arith.mulf %3, %4 : vector<1x8xf32>
    %6 = arith.mulf %2, %2 : vector<1x8xf32>
    %7 = arith.subf %5, %6 : vector<1x8xf32>
    %cst_4 = arith.constant 0.000000e+00 : f32
    %8 = vector.broadcast %cst_4 : f32 to vector<1x8xf32>
    %9 = arith.maximumf %7, %8 : vector<1x8xf32>
    %cst_5 = arith.constant 9.99999974E-6 : f32
    %10 = vector.broadcast %cst_5 : f32 to vector<1x8xf32>
    %11 = arith.addf %9, %10 : vector<1x8xf32>
    %12 = math.rsqrt %11 : vector<1x8xf32>
    %c0_6 = arith.constant 0 : index
    %c0_7 = arith.constant 0 : index
    %13 = vector.load %arg1[%c0_6, %c0_7] : memref<128x8xf32, #tpu.memory_space<vmem>>, vector<128x8xf32>
    %14 = vector.broadcast %2 : vector<1x8xf32> to vector<128x8xf32>
    %15 = arith.subf %13, %14 : vector<128x8xf32>
    %c0_8 = arith.constant 0 : index
    %c0_9 = arith.constant 0 : index
    %16 = vector.load %arg4[%c0_8, %c0_9] : memref<1x8xf32, #tpu.memory_space<vmem>>, vector<1x8xf32>
    %17 = arith.mulf %12, %16 : vector<1x8xf32>
    %18 = vector.broadcast %17 : vector<1x8xf32> to vector<128x8xf32>
    %19 = arith.mulf %15, %18 : vector<128x8xf32>
    %c0_10 = arith.constant 0 : index
    %c0_11 = arith.constant 0 : index
    %20 = vector.load %arg5[%c0_10, %c0_11] : memref<1x8xf32, #tpu.memory_space<vmem>>, vector<1x8xf32>
    %21 = vector.broadcast %20 : vector<1x8xf32> to vector<128x8xf32>
    %22 = arith.addf %19, %21 : vector<128x8xf32>
    %c0_12 = arith.constant 0 : index
    %c0_13 = arith.constant 0 : index
    %23 = vector.load %arg6[%c0_12, %c0_13] : memref<128x8xf32, #tpu.memory_space<vmem>>, vector<128x8xf32>
    tpu.vector_store %arg6[%c0_12, %c0_13], %22 {strides = array<i32>} : memref<128x8xf32, #tpu.memory_space<vmem>>, vector<128x8xf32>,
    return
  }
  func.func @transform_0(%arg0: i32) -> (i32, i32) {
    %c0_i32 = arith.constant 0 : i32
    %c0_i32_0 = arith.constant 0 : i32
    return %arg0, %c0_i32 : i32, i32
  }
  func.func @transform_1(%arg0: i32) -> (i32, i32) {
    %c0_i32 = arith.constant 0 : i32
    %c0_i32_0 = arith.constant 0 : i32
    %c0_i32_1 = arith.constant 0 : i32
    return %c0_i32, %c0_i32_0 : i32, i32
  }
  func.func @transform_2(%arg0: i32) -> (i32, i32) {
    %c0_i32 = arith.constant 0 : i32
    %c0_i32_0 = arith.constant 0 : i32
    %c0_i32_1 = arith.constant 0 : i32
    return %c0_i32, %c0_i32_0 : i32, i32
  }
  func.func @transform_3(%arg0: i32) -> (i32, i32) {
    %c0_i32 = arith.constant 0 : i32
    %c0_i32_0 = arith.constant 0 : i32
    %c0_i32_1 = arith.constant 0 : i32
    return %c0_i32, %c0_i32_0 : i32, i32
  }
  func.func @transform_4(%arg0: i32) -> (i32, i32) {
    %c0_i32 = arith.constant 0 : i32
    %c0_i32_0 = arith.constant 0 : i32
    %c0_i32_1 = arith.constant 0 : i32
    return %c0_i32, %c0_i32_0 : i32, i32
  }
  func.func @transform_5(%arg0: i32) -> (i32, i32) {
    %c0_i32 = arith.constant 0 : i32
    %c0_i32_0 = arith.constant 0 : i32
    return %arg0, %c0_i32 : i32, i32
  }
}

module attributes {stable_mosaic.version = 11 : i64} {
  func.func @kernel(%arg0: i32, %arg1: i32, %arg2: i32, %arg3: i32, %arg4: memref<1x128x64xbf16, #tpu.memory_space<vmem>>, %arg5: memref<1x64x128xbf16, #tpu.memory_space<vmem>>, %arg6: memref<1x128xf32, #tpu.memory_space<vmem>>, %arg7: memref<1x128x128xf32, #tpu.memory_space<vmem>>, %arg8: memref<128x128xf32, #tpu.memory_space<vmem>>) attributes {dimension_semantics = [#tpu.dimension_semantics<parallel>, #tpu.dimension_semantics<parallel>, #tpu.dimension_semantics<parallel>, #tpu.dimension_semantics<arbitrary>], iteration_bounds = array<i64: 4, 1, 1, 1>, scalar_prefetch = 0 : i64, scratch_operands = 1 : i64, tpu.core_type = #tpu.core_type<tc>, window_params = [{transform_indices = @transform_0, window_bounds = array<i64: 1, 128, 64>}, {transform_indices = @transform_1, window_bounds = array<i64: 1, 64, 128>}, {transform_indices = @transform_2, window_bounds = array<i64: 1, 128>}, {transform_indices = @transform_3, window_bounds = array<i64: 1, 128, 128>}]} {
    %c0_i32 = arith.constant 0 : i32
    %0 = arith.cmpi eq, %arg3, %c0_i32 : i32
    %1 = arith.extui %0 : i1 to i32
    %c0_i32_0 = arith.constant 0 : i32
    %2 = arith.cmpi ne, %1, %c0_i32_0 : i32
    scf.if %2 {
      %cst_12 = arith.constant 0.000000e+00 : f32
      %14 = vector.broadcast %cst_12 : f32 to vector<128x128xf32>
      %c0_13 = arith.constant 0 : index
      %c0_14 = arith.constant 0 : index
      %15 = vector.load %arg8[%c0_13, %c0_14] : memref<128x128xf32, #tpu.memory_space<vmem>>, vector<128x128xf32>
      tpu.vector_store %arg8[%c0_13, %c0_14], %14 {strides = array<i32>} : memref<128x128xf32, #tpu.memory_space<vmem>>, vector<128x128xf32>,
    } else {
    }
    %c0 = arith.constant 0 : index
    %c0_1 = arith.constant 0 : index
    %3 = vector.load %arg8[%c0, %c0_1] : memref<128x128xf32, #tpu.memory_space<vmem>>, vector<128x128xf32>
    %c0_2 = arith.constant 0 : index
    %c0_3 = arith.constant 0 : index
    %c0_4 = arith.constant 0 : index
    %4 = vector.load %arg4[%c0_2, %c0_3, %c0_4] : memref<1x128x64xbf16, #tpu.memory_space<vmem>>, vector<1x128x64xbf16>
    %5 = vector.shape_cast %4 : vector<1x128x64xbf16> to vector<128x64xbf16>
    %c0_5 = arith.constant 0 : index
    %c0_6 = arith.constant 0 : index
    %c0_7 = arith.constant 0 : index
    %6 = vector.load %arg5[%c0_5, %c0_6, %c0_7] : memref<1x64x128xbf16, #tpu.memory_space<vmem>>, vector<1x64x128xbf16>
    %7 = vector.shape_cast %6 : vector<1x64x128xbf16> to vector<64x128xbf16>
    %cst = arith.constant dense<0.000000e+00> : vector<128x128xf32>
    %8 = tpu.matmul %5, %7, %cst {dimension_numbers = #tpu.dot_dimension_numbers<[1], [0], [0], [1], [0, 0, 1, 1], [], []>} : vector<128x64xbf16>, vector<64x128xbf16>, vector<128x128xf32> -> vector<128x128xf32>
    %9 = arith.addf %3, %8 : vector<128x128xf32>
    %c0_8 = arith.constant 0 : index
    %c0_9 = arith.constant 0 : index
    %10 = vector.load %arg8[%c0_8, %c0_9] : memref<128x128xf32, #tpu.memory_space<vmem>>, vector<128x128xf32>
    tpu.vector_store %arg8[%c0_8, %c0_9], %9 {strides = array<i32>} : memref<128x128xf32, #tpu.memory_space<vmem>>, vector<128x128xf32>,
    %c0_i32_10 = arith.constant 0 : i32
    %11 = arith.cmpi eq, %arg3, %c0_i32_10 : i32
    %12 = arith.extui %11 : i1 to i32
    %c0_i32_11 = arith.constant 0 : i32
    %13 = arith.cmpi ne, %12, %c0_i32_11 : i32
    scf.if %13 {
      %c0_12 = arith.constant 0 : index
      %c0_13 = arith.constant 0 : index
      %14 = vector.load %arg8[%c0_12, %c0_13] : memref<128x128xf32, #tpu.memory_space<vmem>>, vector<128x128xf32>
      %c0_14 = arith.constant 0 : index
      %c0_15 = arith.constant 0 : index
      %15 = vector.load %arg6[%c0_14, %c0_15] : memref<1x128xf32, #tpu.memory_space<vmem>>, vector<1x128xf32>
      %16 = vector.broadcast %15 : vector<1x128xf32> to vector<128x128xf32>
      %17 = arith.addf %14, %16 : vector<128x128xf32>
      %18 = math.tanh %17 : vector<128x128xf32>
      %c0_16 = arith.constant 0 : index
      %c0_17 = arith.constant 0 : index
      %c0_18 = arith.constant 0 : index
      %19 = vector.load %arg7[%c0_16, %c0_17, %c0_18] : memref<1x128x128xf32, #tpu.memory_space<vmem>>, vector<1x128x128xf32>
      %20 = vector.shape_cast %19 : vector<1x128x128xf32> to vector<128x128xf32>
      %21 = vector.shape_cast %18 : vector<128x128xf32> to vector<1x128x128xf32>
      tpu.vector_store %arg7[%c0_16, %c0_17, %c0_18], %21 {strides = array<i32>} : memref<1x128x128xf32, #tpu.memory_space<vmem>>, vector<1x128x128xf32>,
    } else {
    }
    return
  }
  func.func @transform_0(%arg0: i32, %arg1: i32, %arg2: i32, %arg3: i32) -> (i32, i32, i32) {
    %c0_i32 = arith.constant 0 : i32
    return %arg0, %arg1, %arg3 : i32, i32, i32
  }
  func.func @transform_1(%arg0: i32, %arg1: i32, %arg2: i32, %arg3: i32) -> (i32, i32, i32) {
    %c0_i32 = arith.constant 0 : i32
    return %arg0, %arg3, %arg2 : i32, i32, i32
  }
  func.func @transform_2(%arg0: i32, %arg1: i32, %arg2: i32, %arg3: i32) -> (i32, i32) {
    %c0_i32 = arith.constant 0 : i32
    %c0_i32_0 = arith.constant 0 : i32
    return %c0_i32, %arg2 : i32, i32
  }
  func.func @transform_3(%arg0: i32, %arg1: i32, %arg2: i32, %arg3: i32) -> (i32, i32, i32) {
    %c0_i32 = arith.constant 0 : i32
    return %arg0, %arg1, %arg2 : i32, i32, i32
  }
}

</mosaic_0001>

<bundles_post_ra>
// kernel: unet_apply.12
= control target key start
LH: loop header
LB: loop body
LE: loop exit
PB: predicated region body
PF: predicated region fallthrough
CT: control target
= control target key end

     0   :  { %vm136_vm0 = vcmask 523264   ;;  %s468_s1 = inlined_call_operand.vmem [shape: bf16[1,64,128], index: 1, kind: input, shape index: {}]   ;;  %s469_s0 = inlined_call_operand.vmem [shape: bf16[1,128,64], index: 0, kind: input, shape index: {}]   ;;  %s470_s2 = inlined_call_operand.vmem [shape: f32[1,128,128], index: 2, kind: output, shape index: {}]  }
   0x1   :  { %v348_v0 = vld [vmem:[%s468_s1 + $0x18] sm:$0xff]  ;;  %v347_v1 = vld [vmem:[%s468_s1 + $0x10] sm:$0xff]  ;;  %v346_v2 = vld [vmem:[%s468_s1 + $0x8] sm:$0xff] }
   0x2   :  { %165 = vmatpush.bf16.msra.mxu0 %v348_v0  ;;  %349 = vmatpush.bf16.msra.mxu1 %v348_v0  ;;  %v345_v3 = vld [vmem:[%s468_s1] sm:$0xff]  ;;  %v339_v5 = vld [vmem:[%s469_s0 + $0x10] sm:$0xff]  ;;  %v338_v8 = vld [vmem:[%s469_s0 + $0x8] sm:$0xff] }
   0x3   :  { %350 = vmatpush.bf16.msra.mxu2 %v348_v0  ;;  %351 = vmatpush.bf16.msra.mxu3 %v348_v0  ;;  %v337_v4 = vld [vmem:[%s469_s0] sm:$0xff]  ;;  %v343_v7 = vld [vmem:[%s469_s0 + $0x30] sm:$0xff]  ;;  %v340_v9 = vld [vmem:[%s469_s0 + $0x18] sm:$0xff] }
   0x4   :  { %v341_v6 = vld [vmem:[%s469_s0 + $0x20] sm:$0xff]  ;;  %v342_v10 = vld [vmem:[%s469_s0 + $0x28] sm:$0xff]  ;;  %v344_v11 = vld [vmem:[%s469_s0 + $0x38] sm:$0xff] }
   0x6   :  { %166 = vmatpush.bf16.msra.mxu0 %v347_v1  ;;  %352 = vmatpush.bf16.msra.mxu1 %v347_v1 }
   0x7   :  { %353 = vmatpush.bf16.msra.mxu2 %v347_v1  ;;  %354 = vmatpush.bf16.msra.mxu3 %v347_v1 }
   0xa   :  { %167 = vmatpush.bf16.msra.mxu0 %v346_v2  ;;  %355 = vmatpush.bf16.msra.mxu1 %v346_v2 }
   0xb   :  { %356 = vmatpush.bf16.msra.mxu2 %v346_v2  ;;  %357 = vmatpush.bf16.msra.mxu3 %v346_v2 }
   0xe   :  { %168 = vmatpush.bf16.msra.mxu0 %v345_v3  ;;  %358 = vmatpush.bf16.msra.mxu1 %v345_v3 }
   0xf   :  { %359 = vmatpush.bf16.msra.mxu2 %v345_v3  ;;  %360 = vmatpush.bf16.msra.mxu3 %v345_v3 }
  0x11   :  { %329 = vmatmul.msk.bf16.vlgmr.msra.gmra.mxu0 %vm136_vm0, %v337_v4  ;;  %331 = vmatmul.msk.bf16.vlgmr.msra.gmra.mxu1 %vm136_vm0, %v339_v5 }
  0x12   :  { %333 = vmatmul.msk.bf16.vlgmr.msra.gmra.mxu2 %vm136_vm0, %v341_v6  ;;  %335 = vmatmul.msk.bf16.vlgmr.msra.gmra.mxu3 %vm136_vm0, %v343_v7 }
  0x21   :  { %330 = vmatmul.msk.bf16.gmra.mxu0 %vm136_vm0, %v338_v8  ;;  %332 = vmatmul.msk.bf16.gmra.mxu1 %vm136_vm0, %v340_v9 }
  0x22   :  { %334 = vmatmul.msk.bf16.gmra.mxu2 %vm136_vm0, %v342_v10  ;;  %336 = vmatmul.msk.bf16.gmra.mxu3 %vm136_vm0, %v344_v11 }
  0x8e   :  { %v170_v12 = vpop.f32.mrf.mxu0  ;;  %v180_v13 = vpop.f32.mrf.mxu1 }
  0x8f   :  { %261 = vst [vmem:[%s470_s2] sm:$0xff] %v170_v12 }
  0x90   :  { %265 = vst [vmem:[%s470_s2 + $0x20] sm:$0xff] %v180_v13 }
  0x95   :  { %v190_v14 = vpop.f32.mrf.mxu2  ;;  %v200_v15 = vpop.f32.mrf.mxu3 }
  0x96   :  { %269 = vst [vmem:[%s470_s2 + $0x40] sm:$0xff] %v190_v14  ;;  %v172_v16 = vpop.f32.mrf.mxu0  ;;  %v182_v17 = vpop.f32.mrf.mxu1 }
  0x97   :  { %273 = vst [vmem:[%s470_s2 + $0x60] sm:$0xff] %v200_v15 }
  0x98   :  { %262 = vst [vmem:[%s470_s2 + $0x8] sm:$0xff] %v172_v16 }
  0x99   :  { %266 = vst [vmem:[%s470_s2 + $0x28] sm:$0xff] %v182_v17 }
  0x9d   :  { %v192_v18 = vpop.f32.mrf.mxu2  ;;  %v202_v19 = vpop.f32.mrf.mxu3 }
  0x9e   :  { %270 = vst [vmem:[%s470_s2 + $0x48] sm:$0xff] %v192_v18  ;;  %v175_v20 = vpop.f32.mrf.mxu0  ;;  %v185_v21 = vpop.f32.mrf.mxu1 }
  0x9f   :  { %274 = vst [vmem:[%s470_s2 + $0x68] sm:$0xff] %v202_v19 }
  0xa0   :  { %263 = vst [vmem:[%s470_s2 + $0x10] sm:$0xff] %v175_v20 }
  0xa1   :  { %267 = vst [vmem:[%s470_s2 + $0x30] sm:$0xff] %v185_v21 }
  0xa5   :  { %v195_v22 = vpop.f32.mrf.mxu2  ;;  %v205_v23 = vpop.f32.mrf.mxu3 }
  0xa6   :  { %271 = vst [vmem:[%s470_s2 + $0x50] sm:$0xff] %v195_v22  ;;  %v177_v24 = vpop.f32.mrf.mxu0  ;;  %v187_v25 = vpop.f32.mrf.mxu1 }
  0xa7   :  { %275 = vst [vmem:[%s470_s2 + $0x70] sm:$0xff] %v205_v23 }
  0xa8   :  { %264 = vst [vmem:[%s470_s2 + $0x18] sm:$0xff] %v177_v24 }
  0xa9   :  { %268 = vst [vmem:[%s470_s2 + $0x38] sm:$0xff] %v187_v25 }
  0xad   :  { %v197_v26 = vpop.f32.mrf.mxu2  ;;  %v207_v27 = vpop.f32.mrf.mxu3 }
  0xae   :  { %272 = vst [vmem:[%s470_s2 + $0x58] sm:$0xff] %v197_v26 }
  0xaf   :  { %276 = vst [vmem:[%s470_s2 + $0x78] sm:$0xff] %v207_v27 }

// kernel: unet_apply.14
= control target key start
LH: loop header
LB: loop body
LE: loop exit
PB: predicated region body
PF: predicated region fallthrough
CT: control target
= control target key end

     0   :  { %vm14_vm0 = vcmask 122880   ;;  %vm22_vm1 = vcmask 130048   ;;  %v68_v0 = vmov 0.0   ;;  %s126_s0 = inlined_call_operand.vmem [shape: f32[32,16], index: 0, kind: input, shape index: {}]   ;;  %s127_s1 = inlined_call_operand.vmem [shape: f32[1,16], index: 1, kind: output, shape index: {0}]   ;;  %s128_s2 = inlined_call_operand.vmem [shape: f32[1,16], index: 2, kind: output, shape index: {1}]  }
   0x1   :  { %15 = vst.msk [vmem:[%s127_s1] sm:$0x1] %vm14_vm0, %v68_v0  ;;  %v17_v1 = vld [vmem:[%s126_s0] sm:$0xff]  ;;  %v18_v2 = vld [vmem:[%s126_s0 + $0x8] sm:$0xff]  ;;  %v19_v3 = vld [vmem:[%s126_s0 + $0x10] sm:$0xff] }
   0x2   :  { %v20_v4 = vld [vmem:[%s126_s0 + $0x18] sm:$0xff]  ;;  %v23_v5 = vsel %vm22_vm1, %v17_v1, 0.0  ;;  %v24_v6 = vsel %vm22_vm1, %v18_v2, 0.0  ;;  %v26_v7 = vsel %vm22_vm1, %v19_v3, 0.0  ;;  %16 = vst.msk [vmem:[%s128_s2] sm:$0x1] %vm14_vm0, %v68_v0  ;;  %v40_v8 = vmul.f32 %v17_v1, %v17_v1 }
   0x3   :  { %v25_v9 = vadd.f32 %v24_v6, %v23_v5  ;;  %v41_v10 = vmul.f32 %v18_v2, %v18_v2  ;;  %v42_v11 = vmul.f32 %v19_v3, %v19_v3  ;;  %v28_v12 = vsel %vm22_vm1, %v20_v4, 0.0 }
   0x4   :  { %v43_v13 = vmul.f32 %v20_v4, %v20_v4  ;;  %v44_v14 = vsel %vm22_vm1, %v40_v8, 0.0 }
   0x5   :  { %v27_v15 = vadd.f32 %v26_v7, %v25_v9  ;;  %v45_v16 = vsel %vm22_vm1, %v41_v10, 0.0  ;;  %v47_v17 = vsel %vm22_vm1, %v42_v11, 0.0 }
   0x6   :  { %v46_v18 = vadd.f32 %v45_v16, %v44_v14  ;;  %v49_v20 = vsel %vm22_vm1, %v43_v13, 0.0 }
   0x7   :  { %v29_v19 = vadd.f32 %v28_v12, %v27_v15 }
   0x8   :  { %v48_v21 = vadd.f32 %v47_v17, %v46_v18  ;;  %v21_v31 = vld [vmem:[%s127_s1] sm:$0x1] }
   0x9   :  { %v30_v22 = vrot.slane %v29_v19, 4  ;;  %v39_v36 = vld [vmem:[%s128_s2] sm:$0x1] }
   0xa   :  { %v50_v23 = vadd.f32 %v49_v20, %v48_v21 }
   0xb   :  { %v31_v24 = vadd.f32 %v30_v22, %v29_v19 }
   0xc   :  { %v51_v25 = vrot.slane %v50_v23, 4 }
   0xd   :  { %v32_v26 = vrot.slane %v31_v24, 2 }
   0xe   :  { %v52_v27 = vadd.f32 %v51_v25, %v50_v23 }
   0xf   :  { %v33_v28 = vadd.f32 %v32_v26, %v31_v24 }
  0x10   :  { %v53_v29 = vrot.slane %v52_v27, 2 }
  0x11   :  { %v34_v30 = vrot.slane %v33_v28, 1 }
  0x12   :  { %v54_v32 = vadd.f32 %v53_v29, %v52_v27 }
  0x13   :  { %v35_v33 = vadd.f32 %v34_v30, %v33_v28 }
  0x14   :  { %v55_v34 = vrot.slane %v54_v32, 1 }
  0x15   :  { %v36_v35 = vadd.f32 %v35_v33, %v21_v31 }
  0x16   :  { %v56_v37 = vadd.f32 %v55_v34, %v54_v32 }
  0x17   :  { %38 = vst.msk [vmem:[%s127_s1] sm:$0x1] %vm14_vm0, %v36_v35 }
  0x18   :  { %v57_v38 = vadd.f32 %v56_v37, %v39_v36 }
  0x1a   :  { %58 = vst.msk [vmem:[%s128_s2] sm:$0x1] %vm14_vm0, %v57_v38 }

// kernel: unet_apply.13
= control target key start
LH: loop header
LB: loop body
LE: loop exit
PB: predicated region body
PF: predicated region fallthrough
CT: control target
= control target key end

     0   :  { %s260_s1 = inlined_call_operand.vmem [shape: bf16[1,128,128], index: 1, kind: input, shape index: {}]   ;;  %s261_s0 = inlined_call_operand.vmem [shape: bf16[1,32,128], index: 0, kind: input, shape index: {}]   ;;  %s262_s2 = inlined_call_operand.vmem [shape: f32[1,32,128], index: 2, kind: output, shape index: {}]  }
   0x1   :  { %v194_v0 = vld [vmem:[%s260_s1 + $0x38] sm:$0xff]  ;;  %v193_v1 = vld [vmem:[%s260_s1 + $0x30] sm:$0xff]  ;;  %v192_v2 = vld [vmem:[%s260_s1 + $0x28] sm:$0xff] }
   0x2   :  { %103 = vmatpush.bf16.msra.mxu0 %v194_v0  ;;  %195 = vmatpush.bf16.msra.mxu1 %v194_v0  ;;  %v191_v3 = vld [vmem:[%s260_s1 + $0x20] sm:$0xff]  ;;  %v190_v4 = vld [vmem:[%s260_s1 + $0x18] sm:$0xff]  ;;  %v189_v5 = vld [vmem:[%s260_s1 + $0x10] sm:$0xff] }
   0x3   :  { %v188_v6 = vld [vmem:[%s260_s1 + $0x8] sm:$0xff]  ;;  %v187_v7 = vld [vmem:[%s260_s1] sm:$0xff] }
   0x4   :  { %v185_v8 = vld [vmem:[%s261_s0] sm:$0xff]  ;;  %v186_v9 = vld [vmem:[%s261_s0 + $0x8] sm:$0xff] }
   0x6   :  { %104 = vmatpush.bf16.msra.mxu0 %v193_v1  ;;  %196 = vmatpush.bf16.msra.mxu1 %v193_v1 }
   0xa   :  { %105 = vmatpush.bf16.msra.mxu0 %v192_v2  ;;  %197 = vmatpush.bf16.msra.mxu1 %v192_v2 }
   0xe   :  { %106 = vmatpush.bf16.msra.mxu0 %v191_v3  ;;  %198 = vmatpush.bf16.msra.mxu1 %v191_v3 }
  0x12   :  { %107 = vmatpush.bf16.msra.mxu0 %v190_v4  ;;  %199 = vmatpush.bf16.msra.mxu1 %v190_v4 }
  0x16   :  { %108 = vmatpush.bf16.msra.mxu0 %v189_v5  ;;  %200 = vmatpush.bf16.msra.mxu1 %v189_v5 }
  0x1a   :  { %109 = vmatpush.bf16.msra.mxu0 %v188_v6  ;;  %201 = vmatpush.bf16.msra.mxu1 %v188_v6 }
  0x1e   :  { %110 = vmatpush.bf16.msra.mxu0 %v187_v7  ;;  %202 = vmatpush.bf16.msra.mxu1 %v187_v7 }
  0x21   :  { %111 = vmatmul.bf16.vlgmr.msra.gmra.mxu0 %v185_v8  ;;  %116 = vmatmul.bf16.vlgmr.msra.gmra.mxu1 %v186_v9 }
  0x9e   :  { %v112_v10 = vpop.f32.mrf.mxu0  ;;  %v117_v11 = vpop.f32.mrf.mxu1 }
  0x9f   :  { %137 = vst [vmem:[%s262_s2] sm:$0xff] %v112_v10 }
  0xa0   :  { %139 = vst [vmem:[%s262_s2 + $0x10] sm:$0xff] %v117_v11 }
  0xa6   :  { %v114_v12 = vpop.f32.mrf.mxu0  ;;  %v119_v13 = vpop.f32.mrf.mxu1 }
  0xa7   :  { %138 = vst [vmem:[%s262_s2 + $0x8] sm:$0xff] %v114_v12 }
  0xa8   :  { %140 = vst [vmem:[%s262_s2 + $0x18] sm:$0xff] %v119_v13 }

// kernel: unet_apply.15
= control target key start
LH: loop header
LB: loop body
LE: loop exit
PB: predicated region body
PF: predicated region fallthrough
CT: control target
= control target key end

     0   :  { %vm66_vm3 = vcmask 130048   ;;  %s144_s1 = inlined_call_operand.vmem [shape: f32[1,16], index: 1, kind: input, shape index: {}]   ;;  %s145_s2 = inlined_call_operand.vmem [shape: f32[1,16], index: 2, kind: input, shape index: {}]   ;;  %s146_s4 = inlined_call_operand.vmem [shape: f32[1,16], index: 4, kind: input, shape index: {}]   ;;  %s147_s0 = inlined_call_operand.vmem [shape: f32[32,16], index: 0, kind: input, shape index: {}]   ;;  %s148_s3 = inlined_call_operand.vmem [shape: f32[1,16], index: 3, kind: input, shape index: {}]   ;;  %s149_s5 = inlined_call_operand.vmem [shape: f32[32,16], index: 5, kind: output, shape index: {}]  }
   0x1   :  { %v20_v0 = vld [vmem:[%s144_s1] sm:$0x1]  ;;  %v39_v17 = vld [vmem:[%s147_s0 + $0x8] sm:$0xff]  ;;  %v40_v18 = vld [vmem:[%s147_s0 + $0x10] sm:$0xff] }
   0x2   :  { %v22_v1 = vld [vmem:[%s145_s2] sm:$0x1]  ;;  %v21_v2 = vmul.f32 0.03125, %v20_v0  ;;  %v41_v19 = vld [vmem:[%s147_s0 + $0x18] sm:$0xff] }
   0x3   :  { %v23_v3 = vmul.f32 0.03125, %v22_v1  ;;  %v38_v14 = vld [vmem:[%s147_s0] sm:$0xff] }
   0x4   :  { %v24_v4 = vmul.f32 %v21_v2, %v21_v2  ;;  %v43_v13 = vperm.slane %v21_v2, 0  ;;  %v49_v15 = vld [vmem:[%s148_s3] sm:$0x1] }
   0x5   :  { %v75_v27 = vld [vmem:[%s146_s4] ss:$0 sm:$0xff] }
   0x6   :  { %v25_v5 = vsub.f32 %v23_v3, %v24_v4  ;;  %v45_v21 = vsub.f32 %v38_v14, %v43_v13  ;;  %v46_v23 = vsub.f32 %v39_v17, %v43_v13  ;;  %v47_v24 = vsub.f32 %v40_v18, %v43_v13 }
   0x7   :  { %v48_v25 = vsub.f32 %v41_v19, %v43_v13 }
   0x8   :  { %v26_v6 = vmax.f32 %v25_v5, 0.0 }
   0xa   :  { %v27_v7 = vadd.f32 1e-05, %v26_v6 }
   0xc   :  { %76 = vrsqrt.f32 %v27_v7  ;;  %vm34_vm0 = vweird.f32 %v27_v7 }
  0x12   :  { %v77_v8 = vpop.eup %76 }
  0x13   :  { %v29_v9 = vmul.f32 %v77_v8, %v27_v7  ;;  %vm35_vm1 = vweird.f32 %v77_v8 }
  0x14   :  { %vm36_vm2 = vmor %vm34_vm0, %vm35_vm1 }
  0x15   :  { %v30_v10 = vmul.f32 %v77_v8, %v29_v9 }
  0x17   :  { %v31_v11 = vmul.f32 0.5, %v30_v10 }
  0x19   :  { %v32_v12 = vsub.f32 1.5, %v31_v11 }
  0x1b   :  { %v33_v16 = vmul.f32 %v77_v8, %v32_v12 }
  0x1d   :  { %v37_v20 = vsel %vm36_vm2, %v77_v8, %v33_v16 }
  0x1e   :  { %v50_v22 = vmul.f32 %v49_v15, %v37_v20 }
  0x20   :  { %v52_v26 = vperm.slane %v50_v22, 0 }
  0x22   :  { %v54_v28 = vmul.f32 %v52_v26, %v45_v21  ;;  %v55_v29 = vmul.f32 %v52_v26, %v46_v23  ;;  %v56_v30 = vmul.f32 %v52_v26, %v47_v24  ;;  %v57_v31 = vmul.f32 %v52_v26, %v48_v25 }
  0x24   :  { %v62_v32 = vadd.f32 %v75_v27, %v54_v28  ;;  %v63_v33 = vadd.f32 %v75_v27, %v55_v29  ;;  %v64_v34 = vadd.f32 %v75_v27, %v56_v30  ;;  %v65_v35 = vadd.f32 %v75_v27, %v57_v31 }
  0x26   :  { %67 = vst.msk [vmem:[%s149_s5] sm:$0xff] %vm66_vm3, %v62_v32 }
  0x27   :  { %68 = vst.msk [vmem:[%s149_s5 + $0x8] sm:$0xff] %vm66_vm3, %v63_v33 }
  0x28   :  { %69 = vst.msk [vmem:[%s149_s5 + $0x10] sm:$0xff] %vm66_vm3, %v64_v34 }
  0x29   :  { %70 = vst.msk [vmem:[%s149_s5 + $0x18] sm:$0xff] %vm66_vm3, %v65_v35 }

// kernel: unet_apply.16
= control target key start
LH: loop header
LB: loop body
LE: loop exit
PB: predicated region body
PF: predicated region fallthrough
CT: control target
= control target key end

     0   :  { %s339_s1 = inlined_call_operand.vmem [shape: bf16[1,256,128], index: 1, kind: input, shape index: {}]   ;;  %s340_s0 = inlined_call_operand.vmem [shape: bf16[1,8,256], index: 0, kind: input, shape index: {}]   ;;  %s341_s2 = inlined_call_operand.vmem [shape: f32[1,8,128], index: 2, kind: output, shape index: {}]  }
   0x1   :  { %v261_v0 = vld [vmem:[%s339_s1 + $0x38] sm:$0xff]  ;;  %v260_v2 = vld [vmem:[%s339_s1 + $0x30] sm:$0xff]  ;;  %v259_v4 = vld [vmem:[%s339_s1 + $0x28] sm:$0xff] }
   0x2   :  { %v269_v1 = vld [vmem:[%s339_s1 + $0x78] sm:$0xff]  ;;  %153 = vmatpush.bf16.msra.mxu0 %v261_v0  ;;  %v268_v3 = vld [vmem:[%s339_s1 + $0x70] sm:$0xff]  ;;  %v267_v5 = vld [vmem:[%s339_s1 + $0x68] sm:$0xff] }
   0x3   :  { %166 = vmatpush.bf16.msra.mxu1 %v269_v1  ;;  %v258_v6 = vld [vmem:[%s339_s1 + $0x20] sm:$0xff]  ;;  %v257_v8 = vld [vmem:[%s339_s1 + $0x18] sm:$0xff]  ;;  %v256_v10 = vld [vmem:[%s339_s1 + $0x10] sm:$0xff] }
   0x4   :  { %v266_v7 = vld [vmem:[%s339_s1 + $0x60] sm:$0xff]  ;;  %v265_v9 = vld [vmem:[%s339_s1 + $0x58] sm:$0xff]  ;;  %v264_v11 = vld [vmem:[%s339_s1 + $0x50] sm:$0xff] }
   0x5   :  { %v255_v12 = vld [vmem:[%s339_s1 + $0x8] sm:$0xff]  ;;  %v17_v14 = vld [vmem:[%s340_s0] sm:$0xff] }
   0x6   :  { %154 = vmatpush.bf16.msra.mxu0 %v260_v2  ;;  %v263_v13 = vld [vmem:[%s339_s1 + $0x48] sm:$0xff]  ;;  %v51_v15 = vunpack.c.l.b16 %v17_v14  ;;  %v52_v16 = vunpack.c.h.b16 %v17_v14  ;;  %v254_v17 = vld [vmem:[%s339_s1] sm:$0xff] }
   0x7   :  { %167 = vmatpush.bf16.msra.mxu1 %v268_v3  ;;  %v262_v18 = vld [vmem:[%s339_s1 + $0x40] sm:$0xff] }
   0x8   :  { %v53_v19 = vpack.c.b16 %v51_v15, %v51_v15  ;;  %v54_v20 = vpack.c.b16 %v52_v16, %v52_v16 }
   0xa   :  { %155 = vmatpush.bf16.msra.mxu0 %v259_v4 }
   0xb   :  { %168 = vmatpush.bf16.msra.mxu1 %v267_v5 }
   0xe   :  { %156 = vmatpush.bf16.msra.mxu0 %v258_v6 }
   0xf   :  { %169 = vmatpush.bf16.msra.mxu1 %v266_v7 }
  0x12   :  { %157 = vmatpush.bf16.msra.mxu0 %v257_v8 }
  0x13   :  { %170 = vmatpush.bf16.msra.mxu1 %v265_v9 }
  0x16   :  { %158 = vmatpush.bf16.msra.mxu0 %v256_v10 }
  0x17   :  { %171 = vmatpush.bf16.msra.mxu1 %v264_v11 }
  0x1a   :  { %159 = vmatpush.bf16.msra.mxu0 %v255_v12 }
  0x1b   :  { %172 = vmatpush.bf16.msra.mxu1 %v263_v13 }
  0x1e   :  { %160 = vmatpush.bf16.msra.mxu0 %v254_v17 }
  0x1f   :  { %173 = vmatpush.bf16.msra.mxu1 %v262_v18 }
  0x21   :  { %161 = vmatmul.bf16.vlgmr.msra.gmra.mxu0 %v53_v19 }
  0x22   :  { %174 = vmatmul.bf16.vlgmr.msra.gmra.mxu1 %v54_v20 }
  0x9e   :  { %v162_v21 = vpop.f32.mrf.mxu0 }
  0x9f   :  { %v175_v22 = vpop.f32.mrf.mxu1 }
  0xa0   :  { %v176_v23 = vadd.f32 %v175_v22, %v162_v21 }
  0xa2   :  { %185 = vst [vmem:[%s341_s2] sm:$0xff] %v176_v23 }
  0xa6   :  { %v164_v24 = vpop.f32.mrf.mxu0 }
  0xa7   :  { %v177_v25 = vpop.f32.mrf.mxu1 }

// kernel: unet_apply.17
= control target key start
LH: loop header
LB: loop body
LE: loop exit
PB: predicated region body
PF: predicated region fallthrough
CT: control target
= control target key end

     0   :  { %s636_s12 = smov 0   ;;  %s638_s13 = smov 0   ;;  %s675_s0 = inlined_call_operand.vmem [shape: bf16[4,8,128], index: 0, kind: input, shape index: {}]   ;;  %s676_s1 = inlined_call_operand.vmem [shape: bf16[4,128,128], index: 1, kind: input, shape index: {}]   ;;  %s677_s2 = inlined_call_operand.vmem [shape: f32[1,128], index: 2, kind: input, shape index: {}]   ;;  %s678_s3 = inlined_call_operand.vmem [shape: f32[4,8,128], index: 3, kind: output, shape index: {}]  }
   0x1   :  { %s640_s14 = smov 0  }
   0x2 LB: > { %s39_s15 = sadd.s32 1, %s610_s13  ;;  %p519_p0 = scmp.ge.s32.totalorder %s614_s14, 1  ;;  %s614_s14 = sphi %s640_s14, %s13_s14   ;;  %s610_s13 = sphi %s638_s13, %s680_s13   ;;  %s606_s12 = sphi %s636_s12, %s679_s12  }
   0x3   : > { %p41_p1 = scmp.ge.s32.totalorder %s39_s15, 4  ;;  %p206_p2 = scmp.lt.s32.totalorder %s614_s14, 5 }
   0x5   : > { %s682_s15 = smov (%p41_p1, %s39_s15), 0  ;;  %p207_p3 = pnand %p519_p0, %p206_p2 }
   0x6   : > { %p255_p4 = scmp.lt.s32.totalorder (!%p207_p3), %s606_s12, 3 }
   0x7   : > { %210 = sbr.rel (%p207_p3) target bundleno = 181 (0xb5), region = 32 }
   0xc   : > { %s684_s12 = smov (!%p255_p4, %s606_s12), 3  ;;  %v591_v9 = vld [vmem:[%s677_s2] ss:$0 sm:$0xff] }
   0xd   : > { %s558_s16 = sshll.u32 %s684_s12, 6  ;;  %s520_s20 = sshll.u32 %s684_s12, 2 }
   0xe   : > { %s276_s19 = scalar_lea.vmem %s676_s1, %s558_s16  ;;  %s264_s23 = scalar_lea.vmem %s675_s0, %s520_s20 }
   0xf   : > { %v566_v0 = vld [vmem:[%s276_s19 + $0x38] sm:$0xff]  ;;  %v565_v1 = vld [vmem:[%s276_s19 + $0x30] sm:$0xff]  ;;  %v564_v2 = vld [vmem:[%s276_s19 + $0x28] sm:$0xff]  ;;  %s523_s24 = sshll.u32 %s684_s12, 3 }
  0x10   : > { %362 = vmatpush.bf16.msra.mxu0 %v566_v0  ;;  %v563_v3 = vld [vmem:[%s276_s19 + $0x20] sm:$0xff]  ;;  %v562_v4 = vld [vmem:[%s276_s19 + $0x18] sm:$0xff]  ;;  %v561_v5 = vld [vmem:[%s276_s19 + $0x10] sm:$0xff]  ;;  %s290_s29 = scalar_lea.vmem %s678_s3, %s523_s24 }
  0x11   : > { %v560_v6 = vld [vmem:[%s276_s19 + $0x8] sm:$0xff]  ;;  %v559_v7 = vld [vmem:[%s276_s19] sm:$0xff] }
  0x12   : > { %v297_v8 = vld [vmem:[%s264_s23] sm:$0xf] }
  0x14   : > { %363 = vmatpush.bf16.msra.mxu0 %v565_v1 }
  0x18   : > { %364 = vmatpush.bf16.msra.mxu0 %v564_v2 }
  0x1c   : > { %365 = vmatpush.bf16.msra.mxu0 %v563_v3 }
  0x20   : > { %366 = vmatpush.bf16.msra.mxu0 %v562_v4 }
  0x24   : > { %367 = vmatpush.bf16.msra.mxu0 %v561_v5 }
  0x28   : > { %368 = vmatpush.bf16.msra.mxu0 %v560_v6 }
  0x2c   : > { %369 = vmatpush.bf16.msra.mxu0 %v559_v7 }
  0x2f   : > { %370 = vmatmul.bf16.vlgmr.msra.gmra.mxu0 %v297_v8 }
  0xac   : > { %v371_v10 = vpop.f32.mrf.mxu0 }
  0xad   : > { %v385_v11 = vadd.f32 %v591_v9, %v371_v10 }
  0xaf   : > { %386 = vst [vmem:[%s290_s29] sm:$0xff] %v385_v11 }
  0xb4   : > { %v373_v12 = vpop.f32.mrf.mxu0 }
  0xb5 PF: > { %s13_s14 = sadd.s32 1, %s614_s14   ;;  %s679_s12 = smov %s610_s13 }
  0xb6   : > { %p10_p5 = scmp.ge.s32.totalorder %s13_s14, 6   ;;  %s680_s13 = smov %s682_s15 }
  0xb8   :  { %12 = sbr.rel (!%p10_p5) target bundleno = 2 (0x2), region = 76 }

// kernel: unet_apply.20
= control target key start
LH: loop header
LB: loop body
LE: loop exit
PB: predicated region body
PF: predicated region fallthrough
CT: control target
= control target key end

     0   :  { %s725_s12 = smov 0   ;;  %s727_s13 = smov 0   ;;  %s769_s0 = inlined_call_operand.vmem [shape: bf16[4,32,128], index: 0, kind: input, shape index: {}]   ;;  %s770_s1 = inlined_call_operand.vmem [shape: bf16[4,128,128], index: 1, kind: input, shape index: {}]   ;;  %s771_s2 = inlined_call_operand.vmem [shape: f32[1,128], index: 2, kind: input, shape index: {}]   ;;  %s772_s3 = inlined_call_operand.vmem [shape: f32[4,32,128], index: 3, kind: output, shape index: {}]  }
   0x1   :  { %s729_s14 = smov 0  }
   0x2 LB: > { %s39_s15 = sadd.s32 1, %s699_s13  ;;  %p586_p0 = scmp.ge.s32.totalorder %s703_s14, 1  ;;  %s703_s14 = sphi %s729_s14, %s13_s14   ;;  %s699_s13 = sphi %s727_s13, %s774_s13   ;;  %s695_s12 = sphi %s725_s12, %s773_s12  }
   0x3   : > { %p41_p1 = scmp.ge.s32.totalorder %s39_s15, 4  ;;  %p209_p2 = scmp.lt.s32.totalorder %s703_s14, 5 }
   0x5   : > { %s776_s15 = smov (%p41_p1, %s39_s15), 0  ;;  %p210_p3 = pnand %p586_p0, %p209_p2 }
   0x6   : > { %p263_p4 = scmp.lt.s32.totalorder (!%p210_p3), %s695_s12, 3 }
   0x7   : > { %213 = sbr.rel (%p210_p3) target bundleno = 185 (0xb9), region = 32 }
   0xc   : > { %s778_s12 = smov (!%p263_p4, %s695_s12), 3  ;;  %v680_v10 = vld [vmem:[%s771_s2] ss:$0 sm:$0xff] }
   0xd   : > { %s636_s16 = sshll.u32 %s778_s12, 6  ;;  %s635_s20 = sshll.u32 %s778_s12, 4 }
   0xe   : > { %s286_s19 = scalar_lea.vmem %s770_s1, %s636_s16  ;;  %s273_s23 = scalar_lea.vmem %s769_s0, %s635_s20 }
   0xf   : > { %v647_v0 = vld [vmem:[%s286_s19 + $0x38] sm:$0xff]  ;;  %v646_v1 = vld [vmem:[%s286_s19 + $0x30] sm:$0xff]  ;;  %v645_v2 = vld [vmem:[%s286_s19 + $0x28] sm:$0xff]  ;;  %s637_s24 = sshll.u32 %s778_s12, 5 }
  0x10   : > { %396 = vmatpush.bf16.msra.mxu0 %v647_v0  ;;  %648 = vmatpush.bf16.msra.mxu1 %v647_v0  ;;  %v644_v3 = vld [vmem:[%s286_s19 + $0x20] sm:$0xff]  ;;  %v643_v4 = vld [vmem:[%s286_s19 + $0x18] sm:$0xff]  ;;  %v642_v5 = vld [vmem:[%s286_s19 + $0x10] sm:$0xff]  ;;  %s302_s29 = scalar_lea.vmem %s772_s3, %s637_s24 }
  0x11   : > { %v641_v6 = vld [vmem:[%s286_s19 + $0x8] sm:$0xff]  ;;  %v640_v7 = vld [vmem:[%s286_s19] sm:$0xff] }
  0x12   : > { %v638_v8 = vld [vmem:[%s273_s23] sm:$0xff]  ;;  %v639_v9 = vld [vmem:[%s273_s23 + $0x8] sm:$0xff] }
  0x14   : > { %397 = vmatpush.bf16.msra.mxu0 %v646_v1  ;;  %649 = vmatpush.bf16.msra.mxu1 %v646_v1 }
  0x18   : > { %398 = vmatpush.bf16.msra.mxu0 %v645_v2  ;;  %650 = vmatpush.bf16.msra.mxu1 %v645_v2 }
  0x1c   : > { %399 = vmatpush.bf16.msra.mxu0 %v644_v3  ;;  %651 = vmatpush.bf16.msra.mxu1 %v644_v3 }
  0x20   : > { %400 = vmatpush.bf16.msra.mxu0 %v643_v4  ;;  %652 = vmatpush.bf16.msra.mxu1 %v643_v4 }
  0x24   : > { %401 = vmatpush.bf16.msra.mxu0 %v642_v5  ;;  %653 = vmatpush.bf16.msra.mxu1 %v642_v5 }
  0x28   : > { %402 = vmatpush.bf16.msra.mxu0 %v641_v6  ;;  %654 = vmatpush.bf16.msra.mxu1 %v641_v6 }
  0x2c   : > { %403 = vmatpush.bf16.msra.mxu0 %v640_v7  ;;  %655 = vmatpush.bf16.msra.mxu1 %v640_v7 }
  0x2f   : > { %404 = vmatmul.bf16.vlgmr.msra.gmra.mxu0 %v638_v8  ;;  %409 = vmatmul.bf16.vlgmr.msra.gmra.mxu1 %v639_v9 }
  0xac   : > { %v405_v11 = vpop.f32.mrf.mxu0  ;;  %v410_v12 = vpop.f32.mrf.mxu1 }
  0xad   : > { %v434_v13 = vadd.f32 %v680_v10, %v405_v11  ;;  %v436_v14 = vadd.f32 %v680_v10, %v410_v12 }
  0xaf   : > { %438 = vst [vmem:[%s302_s29] sm:$0xff] %v434_v13 }
  0xb0   : > { %440 = vst [vmem:[%s302_s29 + $0x10] sm:$0xff] %v436_v14 }
  0xb4   : > { %v407_v15 = vpop.f32.mrf.mxu0  ;;  %v412_v16 = vpop.f32.mrf.mxu1 }
  0xb5   : > { %v435_v17 = vadd.f32 %v680_v10, %v407_v15  ;;  %v437_v18 = vadd.f32 %v680_v10, %v412_v16 }
  0xb7   : > { %439 = vst [vmem:[%s302_s29 + $0x8] sm:$0xff] %v435_v17 }
  0xb8   : > { %441 = vst [vmem:[%s302_s29 + $0x18] sm:$0xff] %v437_v18 }
  0xb9 PF: > { %s13_s14 = sadd.s32 1, %s703_s14   ;;  %s773_s12 = smov %s699_s13 }
  0xba   : > { %p10_p5 = scmp.ge.s32.totalorder %s13_s14, 6   ;;  %s774_s13 = smov %s776_s15 }
  0xbc   :  { %12 = sbr.rel (!%p10_p5) target bundleno = 2 (0x2), region = 76 }

// kernel: unet_apply.21
= control target key start
LH: loop header
LB: loop body
LE: loop exit
PB: predicated region body
PF: predicated region fallthrough
CT: control target
= control target key end

     0   :  { %vm14_vm0 = vcmask 57344   ;;  %vm34_vm1 = vcmask 64512   ;;  %v140_v0 = vmov 0.0   ;;  %s258_s0 = inlined_call_operand.vmem [shape: f32[128,8], index: 0, kind: input, shape index: {}]   ;;  %s259_s1 = inlined_call_operand.vmem [shape: f32[1,8], index: 1, kind: output, shape index: {0}]   ;;  %s260_s2 = inlined_call_operand.vmem [shape: f32[1,8], index: 2, kind: output, shape index: {1}]  }
   0x1   :  { %15 = vst.msk [vmem:[%s259_s1] sm:$0x1] %vm14_vm0, %v140_v0  ;;  %v17_v1 = vld [vmem:[%s258_s0] sm:$0xff]  ;;  %v18_v2 = vld [vmem:[%s258_s0 + $0x8] sm:$0xff]  ;;  %v19_v3 = vld [vmem:[%s258_s0 + $0x10] sm:$0xff] }
   0x2   :  { %v35_v4 = vsel %vm34_vm1, %v17_v1, 0.0  ;;  %v36_v5 = vsel %vm34_vm1, %v18_v2, 0.0  ;;  %v38_v6 = vsel %vm34_vm1, %v19_v3, 0.0  ;;  %v20_v7 = vld [vmem:[%s258_s0 + $0x18] sm:$0xff]  ;;  %v21_v10 = vld [vmem:[%s258_s0 + $0x20] sm:$0xff]  ;;  %v22_v13 = vld [vmem:[%s258_s0 + $0x28] sm:$0xff]  ;;  %v76_v15 = vmul.f32 %v17_v1, %v17_v1 }
   0x3   :  { %v37_v8 = vadd.f32 %v36_v5, %v35_v4  ;;  %v40_v9 = vsel %vm34_vm1, %v20_v7, 0.0  ;;  %v42_v12 = vsel %vm34_vm1, %v21_v10, 0.0  ;;  %16 = vst.msk [vmem:[%s260_s2] sm:$0x1] %vm14_vm0, %v140_v0  ;;  %v77_v16 = vmul.f32 %v18_v2, %v18_v2  ;;  %v23_v19 = vld [vmem:[%s258_s0 + $0x30] sm:$0xff]  ;;  %v24_v24 = vld [vmem:[%s258_s0 + $0x38] sm:$0xff] }
   0x4   :  { %v78_v17 = vmul.f32 %v19_v3, %v19_v3  ;;  %v44_v18 = vsel %vm34_vm1, %v22_v13, 0.0  ;;  %v79_v21 = vmul.f32 %v20_v7, %v20_v7  ;;  %v46_v22 = vsel %vm34_vm1, %v23_v19, 0.0  ;;  %v25_v31 = vld [vmem:[%s258_s0 + $0x40] sm:$0xff]  ;;  %v26_v37 = vld [vmem:[%s258_s0 + $0x48] sm:$0xff]  ;;  %v27_v43 = vld [vmem:[%s258_s0 + $0x50] sm:$0xff] }
   0x5   :  { %v39_v11 = vadd.f32 %v38_v6, %v37_v8  ;;  %v80_v23 = vmul.f32 %v21_v10, %v21_v10  ;;  %v92_v26 = vsel %vm34_vm1, %v76_v15, 0.0  ;;  %v93_v27 = vsel %vm34_vm1, %v77_v16, 0.0  ;;  %v28_v49 = vld [vmem:[%s258_s0 + $0x58] sm:$0xff]  ;;  %v29_v55 = vld [vmem:[%s258_s0 + $0x60] sm:$0xff]  ;;  %v30_v61 = vld [vmem:[%s258_s0 + $0x68] sm:$0xff] }
   0x6   :  { %v95_v28 = vsel %vm34_vm1, %v78_v17, 0.0  ;;  %v48_v29 = vsel %vm34_vm1, %v24_v24, 0.0  ;;  %v94_v30 = vadd.f32 %v93_v27, %v92_v26  ;;  %v81_v33 = vmul.f32 %v22_v13, %v22_v13  ;;  %v31_v3 = vld [vmem:[%s258_s0 + $0x70] sm:$0xff] }
   0x7   :  { %v41_v14 = vadd.f32 %v40_v9, %v39_v11  ;;  %v97_v34 = vsel %vm34_vm1, %v79_v21, 0.0  ;;  %v50_v35 = vsel %vm34_vm1, %v25_v31, 0.0  ;;  %v82_v39 = vmul.f32 %v23_v19, %v23_v19  ;;  %v32_v9 = vld [vmem:[%s258_s0 + $0x78] sm:$0xff] }
   0x8   :  { %v96_v36 = vadd.f32 %v95_v28, %v94_v30  ;;  %v99_v40 = vsel %vm34_vm1, %v80_v23, 0.0  ;;  %v52_v41 = vsel %vm34_vm1, %v26_v37, 0.0  ;;  %v83_v45 = vmul.f32 %v24_v24, %v24_v24 }
   0x9   :  { %v43_v20 = vadd.f32 %v42_v12, %v41_v14  ;;  %v101_v46 = vsel %vm34_vm1, %v81_v33, 0.0  ;;  %v54_v47 = vsel %vm34_vm1, %v27_v43, 0.0  ;;  %v84_v51 = vmul.f32 %v25_v31, %v25_v31 }
   0xa   :  { %v98_v42 = vadd.f32 %v97_v34, %v96_v36  ;;  %v103_v52 = vsel %vm34_vm1, %v82_v39, 0.0  ;;  %v56_v53 = vsel %vm34_vm1, %v28_v49, 0.0  ;;  %v85_v57 = vmul.f32 %v26_v37, %v26_v37  ;;  %v33_v36 = vld [vmem:[%s259_s1] sm:$0x1] }
   0xb   :  { %v45_v25 = vadd.f32 %v44_v18, %v43_v20  ;;  %v105_v58 = vsel %vm34_vm1, %v83_v45, 0.0  ;;  %v58_v59 = vsel %vm34_vm1, %v29_v55, 0.0  ;;  %v86_v63 = vmul.f32 %v27_v43, %v27_v43 }
   0xc   :  { %v100_v48 = vadd.f32 %v99_v40, %v98_v42  ;;  %v107_v0 = vsel %vm34_vm1, %v84_v51, 0.0  ;;  %v60_v1 = vsel %vm34_vm1, %v30_v61, 0.0  ;;  %v87_v5 = vmul.f32 %v28_v49, %v28_v49 }
   0xd   :  { %v47_v32 = vadd.f32 %v46_v22, %v45_v25  ;;  %v109_v6 = vsel %vm34_vm1, %v85_v57, 0.0  ;;  %v62_v7 = vsel %vm34_vm1, %v31_v3, 0.0  ;;  %v88_v11 = vmul.f32 %v29_v55, %v29_v55 }
   0xe   :  { %v102_v54 = vadd.f32 %v101_v46, %v100_v48  ;;  %v111_v12 = vsel %vm34_vm1, %v86_v63, 0.0  ;;  %v64_v13 = vsel %vm34_vm1, %v32_v9, 0.0  ;;  %v89_v16 = vmul.f32 %v30_v61, %v30_v61 }
   0xf   :  { %v49_v38 = vadd.f32 %v48_v29, %v47_v32  ;;  %v113_v17 = vsel %vm34_vm1, %v87_v5, 0.0  ;;  %v90_v20 = vmul.f32 %v31_v3, %v31_v3  ;;  %v115_v21 = vsel %vm34_vm1, %v88_v11, 0.0 }
  0x10   :  { %v104_v60 = vadd.f32 %v103_v52, %v102_v54  ;;  %v91_v24 = vmul.f32 %v32_v9, %v32_v9  ;;  %v117_v25 = vsel %vm34_vm1, %v89_v16, 0.0 }
  0x11   :  { %v51_v44 = vadd.f32 %v50_v35, %v49_v38  ;;  %v119_v28 = vsel %vm34_vm1, %v90_v20, 0.0 }
  0x12   :  { %v106_v2 = vadd.f32 %v105_v58, %v104_v60  ;;  %v121_v31 = vsel %vm34_vm1, %v91_v24, 0.0 }
  0x13   :  { %v53_v50 = vadd.f32 %v52_v41, %v51_v44  ;;  %v75_v44 = vld [vmem:[%s260_s2] sm:$0x1] }
  0x14   :  { %v108_v8 = vadd.f32 %v107_v0, %v106_v2 }
  0x15   :  { %v55_v56 = vadd.f32 %v54_v47, %v53_v50 }
  0x16   :  { %v110_v14 = vadd.f32 %v109_v6, %v108_v8 }
  0x17   :  { %v57_v62 = vadd.f32 %v56_v53, %v55_v56 }
  0x18   :  { %v112_v18 = vadd.f32 %v111_v12, %v110_v14 }
  0x19   :  { %v59_v4 = vadd.f32 %v58_v59, %v57_v62 }
  0x1a   :  { %v114_v22 = vadd.f32 %v113_v17, %v112_v18 }
  0x1b   :  { %v61_v10 = vadd.f32 %v60_v1, %v59_v4 }
  0x1c   :  { %v116_v26 = vadd.f32 %v115_v21, %v114_v22 }
  0x1d   :  { %v63_v15 = vadd.f32 %v62_v7, %v61_v10 }
  0x1e   :  { %v118_v29 = vadd.f32 %v117_v25, %v116_v26 }
  0x1f   :  { %v65_v19 = vadd.f32 %v64_v13, %v63_v15 }
  0x20   :  { %v120_v32 = vadd.f32 %v119_v28, %v118_v29 }
  0x21   :  { %v66_v23 = vrot.slane %v65_v19, 4 }
  0x22   :  { %v122_v34 = vadd.f32 %v121_v31, %v120_v32 }
  0x23   :  { %v67_v27 = vadd.f32 %v66_v23, %v65_v19 }
  0x24   :  { %v123_v37 = vrot.slane %v122_v34, 4 }
  0x25   :  { %v68_v30 = vrot.slane %v67_v27, 2 }
  0x26   :  { %v124_v39 = vadd.f32 %v123_v37, %v122_v34 }
  0x27   :  { %v69_v33 = vadd.f32 %v68_v30, %v67_v27 }
  0x28   :  { %v125_v41 = vrot.slane %v124_v39, 2 }
  0x29   :  { %v70_v35 = vrot.slane %v69_v33, 1 }
  0x2a   :  { %v126_v42 = vadd.f32 %v125_v41, %v124_v39 }
  0x2b   :  { %v71_v38 = vadd.f32 %v70_v35, %v69_v33 }
  0x2c   :  { %v127_v43 = vrot.slane %v126_v42, 1 }
  0x2d   :  { %v72_v40 = vadd.f32 %v71_v38, %v33_v36 }
  0x2e   :  { %v128_v45 = vadd.f32 %v127_v43, %v126_v42 }
  0x2f   :  { %74 = vst.msk [vmem:[%s259_s1] sm:$0x1] %vm14_vm0, %v72_v40 }
  0x30   :  { %v129_v46 = vadd.f32 %v128_v45, %v75_v44 }
  0x32   :  { %130 = vst.msk [vmem:[%s260_s2] sm:$0x1] %vm14_vm0, %v129_v46 }

// kernel: unet_apply.22
= control target key start
LH: loop header
LB: loop body
LE: loop exit
PB: predicated region body
PF: predicated region fallthrough
CT: control target
= control target key end

     0   :  { %vm114_vm3 = vcmask 64512   ;;  %s328_s1 = inlined_call_operand.vmem [shape: f32[1,8], index: 1, kind: input, shape index: {}]   ;;  %s329_s2 = inlined_call_operand.vmem [shape: f32[1,8], index: 2, kind: input, shape index: {}]   ;;  %s330_s4 = inlined_call_operand.vmem [shape: f32[1,8], index: 4, kind: input, shape index: {}]   ;;  %s331_s0 = inlined_call_operand.vmem [shape: f32[128,8], index: 0, kind: input, shape index: {}]   ;;  %s332_s3 = inlined_call_operand.vmem [shape: f32[1,8], index: 3, kind: input, shape index: {}]   ;;  %s333_s5 = inlined_call_operand.vmem [shape: f32[128,8], index: 5, kind: output, shape index: {}]  }
   0x1   :  { %v20_v0 = vld [vmem:[%s328_s1] sm:$0x1]  ;;  %v39_v17 = vld [vmem:[%s331_s0 + $0x8] sm:$0xff]  ;;  %v40_v18 = vld [vmem:[%s331_s0 + $0x10] sm:$0xff] }
   0x2   :  { %v22_v1 = vld [vmem:[%s329_s2] sm:$0x1]  ;;  %v21_v2 = vmul.f32 0.0078125, %v20_v0  ;;  %v41_v19 = vld [vmem:[%s331_s0 + $0x18] sm:$0xff]  ;;  %v43_v21 = vld [vmem:[%s331_s0 + $0x28] sm:$0xff] }
   0x3   :  { %v23_v3 = vmul.f32 0.0078125, %v22_v1  ;;  %v38_v14 = vld [vmem:[%s331_s0] sm:$0xff]  ;;  %v44_v24 = vld [vmem:[%s331_s0 + $0x30] sm:$0xff]  ;;  %v45_v29 = vld [vmem:[%s331_s0 + $0x38] sm:$0xff] }
   0x4   :  { %v24_v4 = vmul.f32 %v21_v2, %v21_v2  ;;  %v174_v13 = vperm.slane %v21_v2, 0  ;;  %v73_v15 = vld [vmem:[%s332_s3] sm:$0x1]  ;;  %v47_v36 = vld [vmem:[%s331_s0 + $0x48] sm:$0xff]  ;;  %v48_v37 = vld [vmem:[%s331_s0 + $0x50] sm:$0xff] }
   0x5   :  { %v42_v20 = vld [vmem:[%s331_s0 + $0x20] sm:$0xff]  ;;  %v49_v44 = vld [vmem:[%s331_s0 + $0x58] sm:$0xff]  ;;  %v51_v54 = vld [vmem:[%s331_s0 + $0x68] sm:$0xff] }
   0x6   :  { %v25_v5 = vsub.f32 %v23_v3, %v24_v4  ;;  %v57_v23 = vsub.f32 %v38_v14, %v174_v13  ;;  %v58_v26 = vsub.f32 %v39_v17, %v174_v13  ;;  %v59_v27 = vsub.f32 %v40_v18, %v174_v13  ;;  %v46_v30 = vld [vmem:[%s331_s0 + $0x40] sm:$0xff]  ;;  %v52_v58 = vld [vmem:[%s331_s0 + $0x70] sm:$0xff]  ;;  %v53_v62 = vld [vmem:[%s331_s0 + $0x78] sm:$0xff] }
   0x7   :  { %v60_v28 = vsub.f32 %v41_v19, %v174_v13  ;;  %v61_v31 = vsub.f32 %v42_v20, %v174_v13  ;;  %v62_v32 = vsub.f32 %v43_v21, %v174_v13  ;;  %v215_v34 = vld [vmem:[%s330_s4] ss:$0 sm:$0xff]  ;;  %v63_v35 = vsub.f32 %v44_v24, %v174_v13 }
   0x8   :  { %v26_v6 = vmax.f32 %v25_v5, 0.0  ;;  %v64_v38 = vsub.f32 %v45_v29, %v174_v13  ;;  %v65_v39 = vsub.f32 %v46_v30, %v174_v13  ;;  %v66_v47 = vsub.f32 %v47_v36, %v174_v13  ;;  %v50_v49 = vld [vmem:[%s331_s0 + $0x60] sm:$0xff] }
   0x9   :  { %v67_v48 = vsub.f32 %v48_v37, %v174_v13  ;;  %v68_v57 = vsub.f32 %v49_v44, %v174_v13  ;;  %v69_v61 = vsub.f32 %v50_v49, %v174_v13  ;;  %v70_v1 = vsub.f32 %v51_v54, %v174_v13 }
   0xa   :  { %v27_v7 = vadd.f32 1e-05, %v26_v6  ;;  %v71_v4 = vsub.f32 %v52_v58, %v174_v13 }
   0xc   :  { %136 = vrsqrt.f32 %v27_v7  ;;  %vm34_vm0 = vweird.f32 %v27_v7 }
  0x12   :  { %v137_v8 = vpop.eup %136 }
  0x13   :  { %v29_v9 = vmul.f32 %v137_v8, %v27_v7  ;;  %vm35_vm1 = vweird.f32 %v137_v8  ;;  %v72_v7 = vsub.f32 %v53_v62, %v174_v13 }
  0x14   :  { %vm36_vm2 = vmor %vm34_vm0, %vm35_vm1 }
  0x15   :  { %v30_v10 = vmul.f32 %v137_v8, %v29_v9 }
  0x17   :  { %v31_v11 = vmul.f32 0.5, %v30_v10 }
  0x19   :  { %v32_v12 = vsub.f32 1.5, %v31_v11 }
  0x1b   :  { %v33_v16 = vmul.f32 %v137_v8, %v32_v12 }
  0x1d   :  { %v37_v22 = vsel %vm36_vm2, %v137_v8, %v33_v16 }
  0x1e   :  { %v74_v25 = vmul.f32 %v73_v15, %v37_v22 }
  0x20   :  { %v76_v33 = vperm.slane %v74_v25, 0 }
  0x22   :  { %v78_v40 = vmul.f32 %v76_v33, %v57_v23  ;;  %v79_v41 = vmul.f32 %v76_v33, %v58_v26  ;;  %v80_v42 = vmul.f32 %v76_v33, %v59_v27  ;;  %v81_v43 = vmul.f32 %v76_v33, %v60_v28 }
  0x23   :  { %v82_v45 = vmul.f32 %v76_v33, %v61_v31  ;;  %v83_v46 = vmul.f32 %v76_v33, %v62_v32  ;;  %v84_v53 = vmul.f32 %v76_v33, %v63_v35  ;;  %v85_v56 = vmul.f32 %v76_v33, %v64_v38 }
  0x24   :  { %v98_v50 = vadd.f32 %v215_v34, %v78_v40  ;;  %v99_v51 = vadd.f32 %v215_v34, %v79_v41  ;;  %v100_v52 = vadd.f32 %v215_v34, %v80_v42  ;;  %v101_v55 = vadd.f32 %v215_v34, %v81_v43 }
  0x25   :  { %v102_v59 = vadd.f32 %v215_v34, %v82_v45  ;;  %v86_v60 = vmul.f32 %v76_v33, %v65_v39  ;;  %v103_v63 = vadd.f32 %v215_v34, %v83_v46  ;;  %v87_v0 = vmul.f32 %v76_v33, %v66_v47 }
  0x26   :  { %115 = vst.msk [vmem:[%s333_s5] sm:$0xff] %vm114_vm3, %v98_v50  ;;  %v104_v2 = vadd.f32 %v215_v34, %v84_v53  ;;  %v88_v3 = vmul.f32 %v76_v33, %v67_v48  ;;  %v105_v5 = vadd.f32 %v215_v34, %v85_v56  ;;  %v89_v6 = vmul.f32 %v76_v33, %v68_v57 }
  0x27   :  { %116 = vst.msk [vmem:[%s333_s5 + $0x8] sm:$0xff] %vm114_vm3, %v99_v51  ;;  %v106_v8 = vadd.f32 %v215_v34, %v86_v60  ;;  %v90_v9 = vmul.f32 %v76_v33, %v69_v61  ;;  %v107_v10 = vadd.f32 %v215_v34, %v87_v0  ;;  %v91_v11 = vmul.f32 %v76_v33, %v70_v1 }
  0x28   :  { %117 = vst.msk [vmem:[%s333_s5 + $0x10] sm:$0xff] %vm114_vm3, %v100_v52  ;;  %v108_v12 = vadd.f32 %v215_v34, %v88_v3  ;;  %v92_v13 = vmul.f32 %v76_v33, %v71_v4  ;;  %v109_v14 = vadd.f32 %v215_v34, %v89_v6  ;;  %v93_v15 = vmul.f32 %v76_v33, %v72_v7 }
  0x29   :  { %118 = vst.msk [vmem:[%s333_s5 + $0x18] sm:$0xff] %vm114_vm3, %v101_v55  ;;  %v110_v16 = vadd.f32 %v215_v34, %v90_v9  ;;  %v111_v17 = vadd.f32 %v215_v34, %v91_v11 }
  0x2a   :  { %119 = vst.msk [vmem:[%s333_s5 + $0x20] sm:$0xff] %vm114_vm3, %v102_v59  ;;  %v112_v18 = vadd.f32 %v215_v34, %v92_v13  ;;  %v113_v19 = vadd.f32 %v215_v34, %v93_v15 }
  0x2b   :  { %120 = vst.msk [vmem:[%s333_s5 + $0x28] sm:$0xff] %vm114_vm3, %v103_v63 }
  0x2c   :  { %121 = vst.msk [vmem:[%s333_s5 + $0x30] sm:$0xff] %vm114_vm3, %v104_v2 }
  0x2d   :  { %122 = vst.msk [vmem:[%s333_s5 + $0x38] sm:$0xff] %vm114_vm3, %v105_v5 }
  0x2e   :  { %123 = vst.msk [vmem:[%s333_s5 + $0x40] sm:$0xff] %vm114_vm3, %v106_v8 }
  0x2f   :  { %124 = vst.msk [vmem:[%s333_s5 + $0x48] sm:$0xff] %vm114_vm3, %v107_v10 }
  0x30   :  { %125 = vst.msk [vmem:[%s333_s5 + $0x50] sm:$0xff] %vm114_vm3, %v108_v12 }
  0x31   :  { %126 = vst.msk [vmem:[%s333_s5 + $0x58] sm:$0xff] %vm114_vm3, %v109_v14 }
  0x32   :  { %127 = vst.msk [vmem:[%s333_s5 + $0x60] sm:$0xff] %vm114_vm3, %v110_v16 }
  0x33   :  { %128 = vst.msk [vmem:[%s333_s5 + $0x68] sm:$0xff] %vm114_vm3, %v111_v17 }
  0x34   :  { %129 = vst.msk [vmem:[%s333_s5 + $0x70] sm:$0xff] %vm114_vm3, %v112_v18 }
  0x35   :  { %130 = vst.msk [vmem:[%s333_s5 + $0x78] sm:$0xff] %vm114_vm3, %v113_v19 }

// kernel: unet_apply.23
= control target key start
LH: loop header
LB: loop body
LE: loop exit
PB: predicated region body
PF: predicated region fallthrough
CT: control target
= control target key end

     0   :  { %s943_s12 = smov 0   ;;  %s945_s13 = smov 0   ;;  %s1031_s0 = inlined_call_operand.vmem [shape: bf16[4,128,64], index: 0, kind: input, shape index: {}]   ;;  %s1032_s1 = inlined_call_operand.vmem [shape: bf16[4,64,128], index: 1, kind: input, shape index: {}]   ;;  %s1033_s2 = inlined_call_operand.vmem [shape: f32[1,128], index: 2, kind: input, shape index: {}]   ;;  %s1034_s3 = inlined_call_operand.vmem [shape: f32[4,128,128], index: 3, kind: output, shape index: {}]  }
   0x1   :  { %s947_s14 = smov 0  }
   0x2 LB: > { %s39_s15 = sadd.s32 1, %s917_s13  ;;  %p750_p0 = scmp.ge.s32.totalorder %s921_s14, 1  ;;  %s921_s14 = sphi %s947_s14, %s13_s14   ;;  %s917_s13 = sphi %s945_s13, %s1036_s13   ;;  %s913_s12 = sphi %s943_s12, %s1035_s12  }
   0x3   : > { %p41_p1 = scmp.ge.s32.totalorder %s39_s15, 4  ;;  %p209_p2 = scmp.lt.s32.totalorder %s921_s14, 5 }
   0x5   : > { %s1038_s15 = smov (%p41_p1, %s39_s15), 0  ;;  %p210_p3 = pnand %p750_p0, %p209_p2 }
   0x6   : > { %p263_p4 = scmp.lt.s32.totalorder (!%p210_p3), %s913_s12, 3 }
   0x7   : > { %213 = sbr.rel (%p210_p3) target bundleno = 199 (0xc7), region = 32 }
   0xc   : > { %s1040_s12 = smov (!%p263_p4, %s913_s12), 3  ;;  %vm429_vm0 = vcmask 523264   ;;  %v982_v12 = vld [vmem:[%s1033_s2] ss:$0 sm:$0xff] }
   0xd   : > { %s816_s16 = sshll.u32 %s1040_s12, 5  ;;  %s815_s20 = sshll.u32 %s1040_s12, 6 }
   0xe   : > { %s286_s19 = scalar_lea.vmem %s1032_s1, %s816_s16  ;;  %s273_s23 = scalar_lea.vmem %s1031_s0, %s815_s20 }
   0xf   : > { %v829_v0 = vld [vmem:[%s286_s19 + $0x18] sm:$0xff]  ;;  %v828_v1 = vld [vmem:[%s286_s19 + $0x10] sm:$0xff]  ;;  %v827_v2 = vld [vmem:[%s286_s19 + $0x8] sm:$0xff]  ;;  %s817_s26 = sshll.u32 %s1040_s12, 7 }
  0x10   : > { %458 = vmatpush.bf16.msra.mxu0 %v829_v0  ;;  %830 = vmatpush.bf16.msra.mxu1 %v829_v0  ;;  %v826_v3 = vld [vmem:[%s286_s19] sm:$0xff]  ;;  %v820_v5 = vld [vmem:[%s273_s23 + $0x10] sm:$0xff]  ;;  %v819_v8 = vld [vmem:[%s273_s23 + $0x8] sm:$0xff]  ;;  %s990_s29 = scalar_lea.vmem %s1034_s3, %s817_s26 }
  0x11   : > { %831 = vmatpush.bf16.msra.mxu2 %v829_v0  ;;  %832 = vmatpush.bf16.msra.mxu3 %v829_v0  ;;  %v818_v4 = vld [vmem:[%s273_s23] sm:$0xff]  ;;  %v824_v7 = vld [vmem:[%s273_s23 + $0x30] sm:$0xff]  ;;  %v821_v9 = vld [vmem:[%s273_s23 + $0x18] sm:$0xff] }
  0x12   : > { %v822_v6 = vld [vmem:[%s273_s23 + $0x20] sm:$0xff]  ;;  %v823_v10 = vld [vmem:[%s273_s23 + $0x28] sm:$0xff]  ;;  %v825_v11 = vld [vmem:[%s273_s23 + $0x38] sm:$0xff] }
  0x14   : > { %459 = vmatpush.bf16.msra.mxu0 %v828_v1  ;;  %833 = vmatpush.bf16.msra.mxu1 %v828_v1 }
  0x15   : > { %834 = vmatpush.bf16.msra.mxu2 %v828_v1  ;;  %835 = vmatpush.bf16.msra.mxu3 %v828_v1 }
  0x18   : > { %460 = vmatpush.bf16.msra.mxu0 %v827_v2  ;;  %836 = vmatpush.bf16.msra.mxu1 %v827_v2 }
  0x19   : > { %837 = vmatpush.bf16.msra.mxu2 %v827_v2  ;;  %838 = vmatpush.bf16.msra.mxu3 %v827_v2 }
  0x1c   : > { %461 = vmatpush.bf16.msra.mxu0 %v826_v3  ;;  %839 = vmatpush.bf16.msra.mxu1 %v826_v3 }
  0x1d   : > { %840 = vmatpush.bf16.msra.mxu2 %v826_v3  ;;  %841 = vmatpush.bf16.msra.mxu3 %v826_v3 }
  0x1f   : > { %805 = vmatmul.msk.bf16.vlgmr.msra.gmra.mxu0 %vm429_vm0, %v818_v4  ;;  %807 = vmatmul.msk.bf16.vlgmr.msra.gmra.mxu1 %vm429_vm0, %v820_v5 }
  0x20   : > { %809 = vmatmul.msk.bf16.vlgmr.msra.gmra.mxu2 %vm429_vm0, %v822_v6  ;;  %811 = vmatmul.msk.bf16.vlgmr.msra.gmra.mxu3 %vm429_vm0, %v824_v7 }
  0x2f   : > { %806 = vmatmul.msk.bf16.gmra.mxu0 %vm429_vm0, %v819_v8  ;;  %808 = vmatmul.msk.bf16.gmra.mxu1 %vm429_vm0, %v821_v9 }
  0x30   : > { %810 = vmatmul.msk.bf16.gmra.mxu2 %vm429_vm0, %v823_v10  ;;  %812 = vmatmul.msk.bf16.gmra.mxu3 %vm429_vm0, %v825_v11 }
  0x9c   : > { %v463_v13 = vpop.f32.mrf.mxu0  ;;  %v473_v14 = vpop.f32.mrf.mxu1 }
  0x9d   : > { %v558_v15 = vadd.f32 %v982_v12, %v463_v13  ;;  %v562_v16 = vadd.f32 %v982_v12, %v473_v14 }
  0x9f   : > { %867 = vtanh.f32 %v558_v15 }
  0xa0   : > { %869 = vtanh.f32 %v562_v16 }
  0xa3   : > { %v483_v17 = vpop.f32.mrf.mxu2  ;;  %v493_v18 = vpop.f32.mrf.mxu3 }
  0xa4   : > { %v566_v19 = vadd.f32 %v982_v12, %v483_v17  ;;  %v570_v20 = vadd.f32 %v982_v12, %v493_v18  ;;  %v465_v21 = vpop.f32.mrf.mxu0  ;;  %v475_v22 = vpop.f32.mrf.mxu1 }
  0xa5   : > { %v868_v23 = vpop.eup %867  ;;  %v559_v24 = vadd.f32 %v982_v12, %v465_v21  ;;  %v563_v25 = vadd.f32 %v982_v12, %v475_v22 }
  0xa6   : > { %v870_v26 = vpop.eup %869  ;;  %590 = vst [vmem:[%s990_s29] sm:$0xff] %v868_v23  ;;  %871 = vtanh.f32 %v566_v19 }
  0xa7   : > { %594 = vst [vmem:[%s990_s29 + $0x20] sm:$0xff] %v870_v26  ;;  %873 = vtanh.f32 %v570_v20 }
  0xa8   : > { %875 = vtanh.f32 %v559_v24 }
  0xa9   : > { %877 = vtanh.f32 %v563_v25 }
  0xab   : > { %v485_v27 = vpop.f32.mrf.mxu2  ;;  %v495_v28 = vpop.f32.mrf.mxu3 }
  0xac   : > { %v872_v29 = vpop.eup %871  ;;  %v567_v30 = vadd.f32 %v982_v12, %v485_v27  ;;  %v571_v31 = vadd.f32 %v982_v12, %v495_v28  ;;  %v468_v32 = vpop.f32.mrf.mxu0 }
  0xad   : > { %v478_v33 = vpop.f32.mrf.mxu1  ;;  %v874_v34 = vpop.eup %873  ;;  %598 = vst [vmem:[%s990_s29 + $0x40] sm:$0xff] %v872_v29  ;;  %v560_v35 = vadd.f32 %v982_v12, %v468_v32 }
  0xae   : > { %v564_v36 = vadd.f32 %v982_v12, %v478_v33  ;;  %v876_v37 = vpop.eup %875  ;;  %602 = vst [vmem:[%s990_s29 + $0x60] sm:$0xff] %v874_v34  ;;  %879 = vtanh.f32 %v567_v30 }
  0xaf   : > { %v878_v38 = vpop.eup %877  ;;  %591 = vst [vmem:[%s990_s29 + $0x8] sm:$0xff] %v876_v37  ;;  %881 = vtanh.f32 %v571_v31 }
  0xb0   : > { %595 = vst [vmem:[%s990_s29 + $0x28] sm:$0xff] %v878_v38  ;;  %883 = vtanh.f32 %v560_v35 }
  0xb1   : > { %885 = vtanh.f32 %v564_v36 }
  0xb3   : > { %v488_v39 = vpop.f32.mrf.mxu2  ;;  %v498_v40 = vpop.f32.mrf.mxu3 }
  0xb4   : > { %v880_v41 = vpop.eup %879  ;;  %v568_v42 = vadd.f32 %v982_v12, %v488_v39  ;;  %v572_v43 = vadd.f32 %v982_v12, %v498_v40  ;;  %v470_v44 = vpop.f32.mrf.mxu0 }
  0xb5   : > { %v480_v45 = vpop.f32.mrf.mxu1  ;;  %v882_v46 = vpop.eup %881  ;;  %599 = vst [vmem:[%s990_s29 + $0x48] sm:$0xff] %v880_v41  ;;  %v561_v47 = vadd.f32 %v982_v12, %v470_v44 }
  0xb6   : > { %v565_v48 = vadd.f32 %v982_v12, %v480_v45  ;;  %v884_v49 = vpop.eup %883  ;;  %603 = vst [vmem:[%s990_s29 + $0x68] sm:$0xff] %v882_v46  ;;  %887 = vtanh.f32 %v568_v42 }
  0xb7   : > { %v886_v50 = vpop.eup %885  ;;  %592 = vst [vmem:[%s990_s29 + $0x10] sm:$0xff] %v884_v49  ;;  %889 = vtanh.f32 %v572_v43 }
  0xb8   : > { %596 = vst [vmem:[%s990_s29 + $0x30] sm:$0xff] %v886_v50  ;;  %891 = vtanh.f32 %v561_v47 }
  0xb9   : > { %893 = vtanh.f32 %v565_v48 }
  0xbb   : > { %v490_v51 = vpop.f32.mrf.mxu2  ;;  %v500_v52 = vpop.f32.mrf.mxu3 }
  0xbc   : > { %v888_v53 = vpop.eup %887  ;;  %v569_v54 = vadd.f32 %v982_v12, %v490_v51  ;;  %v573_v55 = vadd.f32 %v982_v12, %v500_v52 }
  0xbd   : > { %v890_v56 = vpop.eup %889  ;;  %600 = vst [vmem:[%s990_s29 + $0x50] sm:$0xff] %v888_v53 }
  0xbe   : > { %v892_v57 = vpop.eup %891  ;;  %604 = vst [vmem:[%s990_s29 + $0x70] sm:$0xff] %v890_v56  ;;  %895 = vtanh.f32 %v569_v54 }
  0xbf   : > { %v894_v58 = vpop.eup %893  ;;  %593 = vst [vmem:[%s990_s29 + $0x18] sm:$0xff] %v892_v57  ;;  %897 = vtanh.f32 %v573_v55 }
  0xc0   : > { %597 = vst [vmem:[%s990_s29 + $0x38] sm:$0xff] %v894_v58 }
  0xc4   : > { %v896_v59 = vpop.eup %895 }
  0xc5   : > { %v898_v60 = vpop.eup %897  ;;  %601 = vst [vmem:[%s990_s29 + $0x58] sm:$0xff] %v896_v59 }
  0xc6   : > { %605 = vst [vmem:[%s990_s29 + $0x78] sm:$0xff] %v898_v60 }
  0xc7 PF: > { %s13_s14 = sadd.s32 1, %s921_s14   ;;  %s1035_s12 = smov %s917_s13 }
  0xc8   : > { %p10_p5 = scmp.ge.s32.totalorder %s13_s14, 6   ;;  %s1036_s13 = smov %s1038_s15 }
  0xca   :  { %12 = sbr.rel (!%p10_p5) target bundleno = 2 (0x2), region = 76 }

</bundles_post_ra>
